<compile_context>
chip_gen: v7x
topology: tpu7x:2x2x1
jax: 0.10.0
libtpu: 0.0.40
codegen_flags: <defaults>
</compile_context>

<pallas_src>
import jax
import jax.numpy as jnp
from jax.experimental import pallas as pl
from jax.experimental.pallas import tpu as pltpu


# Logical (PyTorch) layer widths and the 128-lane-padded widths used on-chip.
LOGICAL_DIMS = [784, 400, 100, 50, 100, 400, 784]
PADDED_DIMS  = [896, 512, 128, 128, 128, 512, 896]


def _round_up(x, m):
    return ((x + m - 1) // m) * m


# ----------------------------- Pallas kernel --------------------------------

def autoencoder_kernel(x_ref,
                       w1_ref, b1_ref, w2_ref, b2_ref, w3_ref, b3_ref,
                       w4_ref, b4_ref, w5_ref, b5_ref, w6_ref, b6_ref,
                       o_ref):
    """Fused 6-layer MLP forward for one (TB, 896) batch tile.

    Weights are bf16 (halved weight DMA, faster MXU passes); matmuls accumulate
    in f32; bias-add / ReLU / sigmoid run in f32 on the VPU/EUP.
    """

    def linear(h, w_ref, b_ref):
        return jnp.dot(h.astype(jnp.bfloat16), w_ref[...],
                       preferred_element_type=jnp.float32) + b_ref[...]

    h = x_ref[...]                                       # (TB, 896) bf16
    # Encoder: 896 -> 512 -> 128 -> 128 (ReLU each); padded lanes stay exactly 0.
    h = jnp.maximum(linear(h, w1_ref, b1_ref), 0.0)
    h = jnp.maximum(linear(h, w2_ref, b2_ref), 0.0)
    h = jnp.maximum(linear(h, w3_ref, b3_ref), 0.0)
    # Decoder: 128 -> 128 -> 512 (ReLU), 512 -> 896 (Sigmoid).
    h = jnp.maximum(linear(h, w4_ref, b4_ref), 0.0)
    h = jnp.maximum(linear(h, w5_ref, b5_ref), 0.0)
    o_ref[...] = jax.nn.sigmoid(linear(h, w6_ref, b6_ref))


# ------------------------------ Host wrapper ---------------------------------

def init_params(key):
    """nn.Linear-style init U(-1/sqrt(fan_in), 1/sqrt(fan_in)) at the logical
    shapes, then zero-padded to lane-aligned shapes.

    Weights are stored as (in_features, out_features) (so the kernel does x @ W + b)
    and pre-cast to bf16; biases stay f32 with shape (1, out_pad).
    """
    params = []
    for idx in range(6):
        fan_in, fan_out = LOGICAL_DIMS[idx], LOGICAL_DIMS[idx + 1]
        pin, pout = PADDED_DIMS[idx], PADDED_DIMS[idx + 1]
        key, kw, kb = jax.random.split(key, 3)
        bound = 1.0 / float(fan_in) ** 0.5
        w = jax.random.uniform(kw, (fan_in, fan_out), jnp.float32, -bound, bound)
        b = jax.random.uniform(kb, (1, fan_out), jnp.float32, -bound, bound)
        w = jnp.pad(w, ((0, pin - fan_in), (0, pout - fan_out))).astype(jnp.bfloat16)
        b = jnp.pad(b, ((0, 0), (0, pout - fan_out)))
        params += [w, b]
    return params


@jax.jit
def autoencoder_forward(x, *params):
    """x: (B, 1, 28, 28) float32  ->  (B, 1, 28, 28) float32 (sigmoid outputs)."""
    batch = x.shape[0]
    d_in, d_out = PADDED_DIMS[0], PADDED_DIMS[-1]

    # Flatten, pad features 784 -> 896 and batch to a tile multiple, cast to bf16
    # (the dtype fed to the first matmul anyway; halves input DMA).
    x_flat = x.reshape(batch, 28 * 28)
    tb = min(256, _round_up(batch, 8))         # batch tile: >=8 sublanes, <=256 rows
    b_pad = _round_up(batch, tb)
    x_pad = jnp.pad(x_flat, ((0, b_pad - batch), (0, d_in - 28 * 28)))
    x_pad = x_pad.astype(jnp.bfloat16)

    # Weight / bias specs: constant index_map -> resident in VMEM across the grid.
    param_specs = []
    for idx in range(6):
        pin, pout = PADDED_DIMS[idx], PADDED_DIMS[idx + 1]
        param_specs.append(pl.BlockSpec((pin, pout), lambda i: (0, 0)))   # weight
        param_specs.append(pl.BlockSpec((1, pout), lambda i: (0, 0)))     # bias

    out_pad = pl.pallas_call(
        autoencoder_kernel,
        out_shape=jax.ShapeDtypeStruct((b_pad, d_out), jnp.float32),
        grid=(b_pad // tb,),
        in_specs=[pl.BlockSpec((tb, d_in), lambda i: (i, 0))] + param_specs,
        out_specs=pl.BlockSpec((tb, d_out), lambda i: (i, 0)),
        compiler_params=pltpu.CompilerParams(
            dimension_semantics=("parallel",),   # megacore sharding on v7x
        ),
    )(x_pad, *params)

    # Drop batch/feature padding, restore NCHW.
    return out_pad[:batch, :28 * 28].reshape(batch, 1, 28, 28)


# --------------------------------- Main ---------------------------------------

if __name__ == "__main__":
    key = jax.random.PRNGKey(0)
    key, pkey, xkey = jax.random.split(key, 3)

    params = init_params(pkey)

    # Small MNIST-like batch: (B=2, C=1, H=28, W=28), values in [0, 1).
    x = jax.random.uniform(xkey, (2, 1, 28, 28), jnp.float32)

    out = autoencoder_forward(x, *params)
    out = jax.block_until_ready(out)

    assert out.shape == (2, 1, 28, 28), out.shape
    assert out.dtype == jnp.float32, out.dtype
    # Sigmoid output sanity check.
    assert bool(jnp.all((out >= 0.0) & (out <= 1.0)))

    print("KERNEL_OK")
</pallas_src>

<mosaic_0001>
module attributes {stable_mosaic.version = 11 : i64} {
  func.func @autoencoder_kernel(%arg0: i32, %arg1: memref<8x896xbf16, #tpu.memory_space<vmem>>, %arg2: memref<896x512xbf16, #tpu.memory_space<vmem>>, %arg3: memref<1x512xf32, #tpu.memory_space<vmem>>, %arg4: memref<512x128xbf16, #tpu.memory_space<vmem>>, %arg5: memref<1x128xf32, #tpu.memory_space<vmem>>, %arg6: memref<128x128xbf16, #tpu.memory_space<vmem>>, %arg7: memref<1x128xf32, #tpu.memory_space<vmem>>, %arg8: memref<128x128xbf16, #tpu.memory_space<vmem>>, %arg9: memref<1x128xf32, #tpu.memory_space<vmem>>, %arg10: memref<128x512xbf16, #tpu.memory_space<vmem>>, %arg11: memref<1x512xf32, #tpu.memory_space<vmem>>, %arg12: memref<512x896xbf16, #tpu.memory_space<vmem>>, %arg13: memref<1x896xf32, #tpu.memory_space<vmem>>, %arg14: memref<8x896xf32, #tpu.memory_space<vmem>>) attributes {dimension_semantics = [#tpu.dimension_semantics<parallel>], iteration_bounds = array<i64: 1>, scalar_prefetch = 0 : i64, scratch_operands = 0 : i64, tpu.core_type = #tpu.core_type<tc>, window_params = [{transform_indices = @transform_0, window_bounds = array<i64: 8, 896>}, {pipeline_mode = #tpu.pipeline_mode<synchronous>, transform_indices = @transform_1, window_bounds = array<i64: 896, 512>}, {pipeline_mode = #tpu.pipeline_mode<synchronous>, transform_indices = @transform_2, window_bounds = array<i64: 1, 512>}, {pipeline_mode = #tpu.pipeline_mode<synchronous>, transform_indices = @transform_3, window_bounds = array<i64: 512, 128>}, {pipeline_mode = #tpu.pipeline_mode<synchronous>, transform_indices = @transform_4, window_bounds = array<i64: 1, 128>}, {pipeline_mode = #tpu.pipeline_mode<synchronous>, transform_indices = @transform_5, window_bounds = array<i64: 128, 128>}, {pipeline_mode = #tpu.pipeline_mode<synchronous>, transform_indices = @transform_6, window_bounds = array<i64: 1, 128>}, {pipeline_mode = #tpu.pipeline_mode<synchronous>, transform_indices = @transform_7, window_bounds = array<i64: 128, 128>}, {pipeline_mode = #tpu.pipeline_mode<synchronous>, transform_indices = @transform_8, window_bounds = array<i64: 1, 128>}, {pipeline_mode = #tpu.pipeline_mode<synchronous>, transform_indices = @transform_9, window_bounds = array<i64: 128, 512>}, {pipeline_mode = #tpu.pipeline_mode<synchronous>, transform_indices = @transform_10, window_bounds = array<i64: 1, 512>}, {pipeline_mode = #tpu.pipeline_mode<synchronous>, transform_indices = @transform_11, window_bounds = array<i64: 512, 896>}, {pipeline_mode = #tpu.pipeline_mode<synchronous>, transform_indices = @transform_12, window_bounds = array<i64: 1, 896>}, {transform_indices = @transform_13, window_bounds = array<i64: 8, 896>}]} {
    %c0 = arith.constant 0 : index
    %c0_0 = arith.constant 0 : index
    %0 = vector.load %arg1[%c0, %c0_0] : memref<8x896xbf16, #tpu.memory_space<vmem>>, vector<8x896xbf16>
    %c0_1 = arith.constant 0 : index
    %c0_2 = arith.constant 0 : index
    %1 = vector.load %arg2[%c0_1, %c0_2] : memref<896x512xbf16, #tpu.memory_space<vmem>>, vector<896x512xbf16>
    %cst = arith.constant dense<0.000000e+00> : vector<8x512xf32>
    %2 = tpu.matmul %0, %1, %cst {dimension_numbers = #tpu.dot_dimension_numbers<[1], [0], [0], [1], [0, 0, 1, 1], [], []>} : vector<8x896xbf16>, vector<896x512xbf16>, vector<8x512xf32> -> vector<8x512xf32>
    %c0_3 = arith.constant 0 : index
    %c0_4 = arith.constant 0 : index
    %3 = vector.load %arg3[%c0_3, %c0_4] : memref<1x512xf32, #tpu.memory_space<vmem>>, vector<1x512xf32>
    %4 = vector.broadcast %3 : vector<1x512xf32> to vector<8x512xf32>
    %5 = arith.addf %2, %4 : vector<8x512xf32>
    %cst_5 = arith.constant 0.000000e+00 : f32
    %6 = vector.broadcast %cst_5 : f32 to vector<8x512xf32>
    %7 = arith.maximumf %5, %6 : vector<8x512xf32>
    %8 = arith.truncf %7 : vector<8x512xf32> to vector<8x512xbf16>
    %c0_6 = arith.constant 0 : index
    %c0_7 = arith.constant 0 : index
    %9 = vector.load %arg4[%c0_6, %c0_7] : memref<512x128xbf16, #tpu.memory_space<vmem>>, vector<512x128xbf16>
    %cst_8 = arith.constant dense<0.000000e+00> : vector<8x128xf32>
    %10 = tpu.matmul %8, %9, %cst_8 {dimension_numbers = #tpu.dot_dimension_numbers<[1], [0], [0], [1], [0, 0, 1, 1], [], []>} : vector<8x512xbf16>, vector<512x128xbf16>, vector<8x128xf32> -> vector<8x128xf32>
    %c0_9 = arith.constant 0 : index
    %c0_10 = arith.constant 0 : index
    %11 = vector.load %arg5[%c0_9, %c0_10] : memref<1x128xf32, #tpu.memory_space<vmem>>, vector<1x128xf32>
    %12 = vector.broadcast %11 : vector<1x128xf32> to vector<8x128xf32>
    %13 = arith.addf %10, %12 : vector<8x128xf32>
    %cst_11 = arith.constant 0.000000e+00 : f32
    %14 = vector.broadcast %cst_11 : f32 to vector<8x128xf32>
    %15 = arith.maximumf %13, %14 : vector<8x128xf32>
    %16 = arith.truncf %15 : vector<8x128xf32> to vector<8x128xbf16>
    %c0_12 = arith.constant 0 : index
    %c0_13 = arith.constant 0 : index
    %17 = vector.load %arg6[%c0_12, %c0_13] : memref<128x128xbf16, #tpu.memory_space<vmem>>, vector<128x128xbf16>
    %cst_14 = arith.constant dense<0.000000e+00> : vector<8x128xf32>
    %18 = tpu.matmul %16, %17, %cst_14 {dimension_numbers = #tpu.dot_dimension_numbers<[1], [0], [0], [1], [0, 0, 1, 1], [], []>} : vector<8x128xbf16>, vector<128x128xbf16>, vector<8x128xf32> -> vector<8x128xf32>
    %c0_15 = arith.constant 0 : index
    %c0_16 = arith.constant 0 : index
    %19 = vector.load %arg7[%c0_15, %c0_16] : memref<1x128xf32, #tpu.memory_space<vmem>>, vector<1x128xf32>
    %20 = vector.broadcast %19 : vector<1x128xf32> to vector<8x128xf32>
    %21 = arith.addf %18, %20 : vector<8x128xf32>
    %cst_17 = arith.constant 0.000000e+00 : f32
    %22 = vector.broadcast %cst_17 : f32 to vector<8x128xf32>
    %23 = arith.maximumf %21, %22 : vector<8x128xf32>
    %24 = arith.truncf %23 : vector<8x128xf32> to vector<8x128xbf16>
    %c0_18 = arith.constant 0 : index
    %c0_19 = arith.constant 0 : index
    %25 = vector.load %arg8[%c0_18, %c0_19] : memref<128x128xbf16, #tpu.memory_space<vmem>>, vector<128x128xbf16>
    %cst_20 = arith.constant dense<0.000000e+00> : vector<8x128xf32>
    %26 = tpu.matmul %24, %25, %cst_20 {dimension_numbers = #tpu.dot_dimension_numbers<[1], [0], [0], [1], [0, 0, 1, 1], [], []>} : vector<8x128xbf16>, vector<128x128xbf16>, vector<8x128xf32> -> vector<8x128xf32>
    %c0_21 = arith.constant 0 : index
    %c0_22 = arith.constant 0 : index
    %27 = vector.load %arg9[%c0_21, %c0_22] : memref<1x128xf32, #tpu.memory_space<vmem>>, vector<1x128xf32>
    %28 = vector.broadcast %27 : vector<1x128xf32> to vector<8x128xf32>
    %29 = arith.addf %26, %28 : vector<8x128xf32>
    %cst_23 = arith.constant 0.000000e+00 : f32
    %30 = vector.broadcast %cst_23 : f32 to vector<8x128xf32>
    %31 = arith.maximumf %29, %30 : vector<8x128xf32>
    %32 = arith.truncf %31 : vector<8x128xf32> to vector<8x128xbf16>
    %c0_24 = arith.constant 0 : index
    %c0_25 = arith.constant 0 : index
    %33 = vector.load %arg10[%c0_24, %c0_25] : memref<128x512xbf16, #tpu.memory_space<vmem>>, vector<128x512xbf16>
    %cst_26 = arith.constant dense<0.000000e+00> : vector<8x512xf32>
    %34 = tpu.matmul %32, %33, %cst_26 {dimension_numbers = #tpu.dot_dimension_numbers<[1], [0], [0], [1], [0, 0, 1, 1], [], []>} : vector<8x128xbf16>, vector<128x512xbf16>, vector<8x512xf32> -> vector<8x512xf32>
    %c0_27 = arith.constant 0 : index
    %c0_28 = arith.constant 0 : index
    %35 = vector.load %arg11[%c0_27, %c0_28] : memref<1x512xf32, #tpu.memory_space<vmem>>, vector<1x512xf32>
    %36 = vector.broadcast %35 : vector<1x512xf32> to vector<8x512xf32>
    %37 = arith.addf %34, %36 : vector<8x512xf32>
    %cst_29 = arith.constant 0.000000e+00 : f32
    %38 = vector.broadcast %cst_29 : f32 to vector<8x512xf32>
    %39 = arith.maximumf %37, %38 : vector<8x512xf32>
    %40 = arith.truncf %39 : vector<8x512xf32> to vector<8x512xbf16>
    %c0_30 = arith.constant 0 : index
    %c0_31 = arith.constant 0 : index
    %41 = vector.load %arg12[%c0_30, %c0_31] : memref<512x896xbf16, #tpu.memory_space<vmem>>, vector<512x896xbf16>
    %cst_32 = arith.constant dense<0.000000e+00> : vector<8x896xf32>
    %42 = tpu.matmul %40, %41, %cst_32 {dimension_numbers = #tpu.dot_dimension_numbers<[1], [0], [0], [1], [0, 0, 1, 1], [], []>} : vector<8x512xbf16>, vector<512x896xbf16>, vector<8x896xf32> -> vector<8x896xf32>
    %c0_33 = arith.constant 0 : index
    %c0_34 = arith.constant 0 : index
    %43 = vector.load %arg13[%c0_33, %c0_34] : memref<1x896xf32, #tpu.memory_space<vmem>>, vector<1x896xf32>
    %44 = vector.broadcast %43 : vector<1x896xf32> to vector<8x896xf32>
    %45 = arith.addf %42, %44 : vector<8x896xf32>
    %46 = arith.negf %45 : vector<8x896xf32>
    %47 = math.exp %46 : vector<8x896xf32>
    %cst_35 = arith.constant 1.000000e+00 : f32
    %48 = vector.broadcast %cst_35 : f32 to vector<8x896xf32>
    %49 = arith.addf %48, %47 : vector<8x896xf32>
    %50 = arith.divf %48, %49 : vector<8x896xf32>
    %c0_36 = arith.constant 0 : index
    %c0_37 = arith.constant 0 : index
    %51 = vector.load %arg14[%c0_36, %c0_37] : memref<8x896xf32, #tpu.memory_space<vmem>>, vector<8x896xf32>
    tpu.vector_store %arg14[%c0_36, %c0_37], %50 {strides = array<i32>} : memref<8x896xf32, #tpu.memory_space<vmem>>, vector<8x896xf32>,
    return
  }
  func.func @transform_0(%arg0: i32) -> (i32, i32) {
    %c0_i32 = arith.constant 0 : i32
    %c0_i32_0 = arith.constant 0 : i32
    return %arg0, %c0_i32 : i32, i32
  }
  func.func @transform_1(%arg0: i32) -> (i32, i32) {
    %c0_i32 = arith.constant 0 : i32
    %c0_i32_0 = arith.constant 0 : i32
    %c0_i32_1 = arith.constant 0 : i32
    return %c0_i32, %c0_i32_0 : i32, i32
  }
  func.func @transform_2(%arg0: i32) -> (i32, i32) {
    %c0_i32 = arith.constant 0 : i32
    %c0_i32_0 = arith.constant 0 : i32
    %c0_i32_1 = arith.constant 0 : i32
    return %c0_i32, %c0_i32_0 : i32, i32
  }
  func.func @transform_3(%arg0: i32) -> (i32, i32) {
    %c0_i32 = arith.constant 0 : i32
    %c0_i32_0 = arith.constant 0 : i32
    %c0_i32_1 = arith.constant 0 : i32
    return %c0_i32, %c0_i32_0 : i32, i32
  }
  func.func @transform_4(%arg0: i32) -> (i32, i32) {
    %c0_i32 = arith.constant 0 : i32
    %c0_i32_0 = arith.constant 0 : i32
    %c0_i32_1 = arith.constant 0 : i32
    return %c0_i32, %c0_i32_0 : i32, i32
  }
  func.func @transform_5(%arg0: i32) -> (i32, i32) {
    %c0_i32 = arith.constant 0 : i32
    %c0_i32_0 = arith.constant 0 : i32
    %c0_i32_1 = arith.constant 0 : i32
    return %c0_i32, %c0_i32_0 : i32, i32
  }
  func.func @transform_6(%arg0: i32) -> (i32, i32) {
    %c0_i32 = arith.constant 0 : i32
    %c0_i32_0 = arith.constant 0 : i32
    %c0_i32_1 = arith.constant 0 : i32
    return %c0_i32, %c0_i32_0 : i32, i32
  }
  func.func @transform_7(%arg0: i32) -> (i32, i32) {
    %c0_i32 = arith.constant 0 : i32
    %c0_i32_0 = arith.constant 0 : i32
    %c0_i32_1 = arith.constant 0 : i32
    return %c0_i32, %c0_i32_0 : i32, i32
  }
  func.func @transform_8(%arg0: i32) -> (i32, i32) {
    %c0_i32 = arith.constant 0 : i32
    %c0_i32_0 = arith.constant 0 : i32
    %c0_i32_1 = arith.constant 0 : i32
    return %c0_i32, %c0_i32_0 : i32, i32
  }
  func.func @transform_9(%arg0: i32) -> (i32, i32) {
    %c0_i32 = arith.constant 0 : i32
    %c0_i32_0 = arith.constant 0 : i32
    %c0_i32_1 = arith.constant 0 : i32
    return %c0_i32, %c0_i32_0 : i32, i32
  }
  func.func @transform_10(%arg0: i32) -> (i32, i32) {
    %c0_i32 = arith.constant 0 : i32
    %c0_i32_0 = arith.constant 0 : i32
    %c0_i32_1 = arith.constant 0 : i32
    return %c0_i32, %c0_i32_0 : i32, i32
  }
  func.func @transform_11(%arg0: i32) -> (i32, i32) {
    %c0_i32 = arith.constant 0 : i32
    %c0_i32_0 = arith.constant 0 : i32
    %c0_i32_1 = arith.constant 0 : i32
    return %c0_i32, %c0_i32_0 : i32, i32
  }
  func.func @transform_12(%arg0: i32) -> (i32, i32) {
    %c0_i32 = arith.constant 0 : i32
    %c0_i32_0 = arith.constant 0 : i32
    %c0_i32_1 = arith.constant 0 : i32
    return %c0_i32, %c0_i32_0 : i32, i32
  }
  func.func @transform_13(%arg0: i32) -> (i32, i32) {
    %c0_i32 = arith.constant 0 : i32
    %c0_i32_0 = arith.constant 0 : i32
    return %arg0, %c0_i32 : i32, i32
  }
}

</mosaic_0001>

<bundles_post_ra>
// kernel: autoencoder_forward.1
= control target key start
LH: loop header
LB: loop body
LE: loop exit
PB: predicated region body
PF: predicated region fallthrough
CT: control target
= control target key end

     0   :  { %18 = vsyncpa [#allocation3], 0  ;;  %s6526_s0 = inlined_call_operand.vmem [shape: bf16[8,896], index: 0, kind: input, shape index: {}]   ;;  %s6527_s1 = inlined_call_operand.hbm [shape: bf16[896,512], index: 1, kind: input, shape index: {}]   ;;  %s6528_s2 = inlined_call_operand.vmem [shape: f32[1,512], index: 2, kind: input, shape index: {}]   ;;  %s6529_s3 = inlined_call_operand.hbm [shape: bf16[512,128], index: 3, kind: input, shape index: {}]   ;;  %s6530_s4 = inlined_call_operand.vmem [shape: f32[1,128], index: 4, kind: input, shape index: {}]   ;;  %s6531_s5 = inlined_call_operand.vmem [shape: bf16[128,128], index: 5, kind: input, shape index: {}]   ;;  %s6532_s6 = inlined_call_operand.vmem [shape: f32[1,128], index: 6, kind: input, shape index: {}]   ;;  %s6533_s7 = inlined_call_operand.vmem [shape: bf16[128,128], index: 7, kind: input, shape index: {}]   ;;  %s6534_s8 = inlined_call_operand.vmem [shape: f32[1,128], index: 8, kind: input, shape index: {}]   ;;  %s6535_s9 = inlined_call_operand.hbm [shape: bf16[128,512], index: 9, kind: input, shape index: {}]   ;;  %s6536_s10 = inlined_call_operand.vmem [shape: f32[1,512], index: 10, kind: input, shape index: {}]   ;;  %s6537_s11 = inlined_call_operand.hbm [shape: bf16[512,896], index: 11, kind: input, shape index: {}]   ;;  %s6538_s12 = inlined_call_operand.vmem [shape: f32[1,896], index: 12, kind: input, shape index: {}]   ;;  %s6539_s13 = inlined_call_operand.vmem [shape: f32[8,896], index: 13, kind: output, shape index: {}]  }
   0x1   :  { %19 = vsyncpa [#allocation5], 0 }
   0x2   :  { %20 = vsyncpa [#allocation8], 0  ;;  %s6163_s25 = smov [#allocation4]   ;;  %s6069_s29 = scalar_lea.hbm %s6529_s3, 4096 }
   0x3   :  { %s42_s26 = sshll.u32 %s6163_s25, 4  ;;  %p6070_p0 = scmp.ne.s32.totalorder %s6529_s3, %s6069_s29  ;;  %s43_s26 = int_to_ptr.vmem [resolvable:$true] %s42_s26 }
   0x4   :  { %p6073_p1 = scmp.lt.u32.totalorder %s6069_s29, %s6529_s3 }
   0x6   :  { %p6075_p2 = pnand %p6073_p1, %p6070_p0 }
   0x8   :  { %6078 = shalt.err (!%p6075_p2)
}
   0x9   :  { %s6079_s17 = scalar_lea.vmem %s43_s26, 4096  ;;  %p6084_p4 = scmp.lt.s32.totalorder %s43_s26, %s43_s26 }
   0xa   :  { %p6080_p3 = scmp.ne.s32.totalorder %s43_s26, %s6079_s17  ;;  %p6085_p5 = scmp.lt.s32.totalorder %s6079_s17, %s6079_s17 }
   0xc   :  { %p6086_p6 = por %p6085_p5, %p6084_p4 }
   0xe   :  { %p6087_p7 = pnand %p6086_p6, %p6080_p3 }
  0x10   :  { %6090 = shalt.err (!%p6087_p7)
}
  0x11   :  { %s6164_s18 = smov 64   ;;  %s6165_s19 = smov 4  }
  0x12   :  { %48 = dma.hbm_to_vmem [thread:$0]  %s6529_s3, 4096, %s43_s26, [#allocation5], %s6164_s18, %s6164_s18, %s6165_s19  }
  0x13   :  { %s6166_s22 = smov [#allocation2]   ;;  %s6091_s27 = scalar_lea.hbm %s6527_s1, 28672 }
  0x14   :  { %s28_s23 = sshll.u32 %s6166_s22, 4  ;;  %p6092_p8 = scmp.ne.s32.totalorder %s6527_s1, %s6091_s27  ;;  %s29_s23 = int_to_ptr.vmem [resolvable:$true] %s28_s23 }
  0x15   :  { %p6095_p9 = scmp.lt.u32.totalorder %s6091_s27, %s6527_s1 }
  0x17   :  { %p6097_p10 = pnand %p6095_p9, %p6092_p8 }
  0x19   :  { %6100 = shalt.err (!%p6097_p10)
}
  0x1a   :  { %s6101_s15 = scalar_lea.vmem %s29_s23, 28672  ;;  %p6106_p12 = scmp.lt.s32.totalorder %s29_s23, %s29_s23 }
  0x1b   :  { %p6102_p11 = scmp.ne.s32.totalorder %s29_s23, %s6101_s15  ;;  %p6107_p13 = scmp.lt.s32.totalorder %s6101_s15, %s6101_s15 }
  0x1d   :  { %p6108_p0 = por %p6107_p13, %p6106_p12 }
  0x1f   :  { %p6109_p1 = pnand %p6108_p0, %p6102_p11 }
  0x21   :  { %6112 = shalt.err (!%p6109_p1)
}
  0x22   :  { %s6167_s3 = smov 256   ;;  %s6168_s26 = smov 16  }
  0x23   :  { %34 = dma.hbm_to_vmem [thread:$0]  %s6527_s1, 28672, %s29_s23, [#allocation3], %s6167_s3, %s6167_s3, %s6168_s26  }
  0x24   :  { %s6169_s18 = smov [#allocation6]   ;;  %s6170_s20 = smov [#allocation7]  }
  0x25   :  { %s64_s19 = sshll.u32 %s6169_s18, 4  ;;  %s78_s21 = sshll.u32 %s6170_s20, 4  ;;  %s65_s19 = int_to_ptr.vmem [resolvable:$true] %s64_s19  ;;  %s6270_s21 = int_to_ptr.vmem [resolvable:$true] %s78_s21 }
  0x26   :  { %s6113_s25 = scalar_lea.hbm %s6535_s9, 4096 }
  0x27   :  { %p6114_p2 = scmp.ne.s32.totalorder %s6535_s9, %s6113_s25  ;;  %p6117_p3 = scmp.lt.u32.totalorder %s6113_s25, %s6535_s9 }
  0x29   :  { %p6119_p4 = pnand %p6117_p3, %p6114_p2 }
  0x2b   :  { %6122 = shalt.err (!%p6119_p4)
}
  0x2c   :  { %s6123_s1 = scalar_lea.vmem %s65_s19, 4096  ;;  %p6128_p6 = scmp.lt.s32.totalorder %s65_s19, %s65_s19 }
  0x2d   :  { %p6124_p5 = scmp.ne.s32.totalorder %s65_s19, %s6123_s1  ;;  %p6129_p7 = scmp.lt.s32.totalorder %s6123_s1, %s6123_s1 }
  0x2f   :  { %p6130_p8 = por %p6129_p7, %p6128_p6 }
  0x31   :  { %p6131_p9 = pnand %p6130_p8, %p6124_p5 }
  0x33   :  { %6134 = shalt.err (!%p6131_p9)
}
  0x34   :  { %70 = dma.hbm_to_vmem [thread:$0]  %s6535_s9, 4096, %s65_s19, [#allocation5], %s6167_s3, %s6167_s3, %s6168_s26  }
  0x35   :  { %s6135_s17 = scalar_lea.hbm %s6537_s11, 28672 }
  0x36   :  { %p6136_p10 = scmp.ne.s32.totalorder %s6537_s11, %s6135_s17  ;;  %p6139_p11 = scmp.lt.u32.totalorder %s6135_s17, %s6537_s11 }
  0x38   :  { %p6141_p12 = pnand %p6139_p11, %p6136_p10 }
  0x3a   :  { %6144 = shalt.err (!%p6141_p12)
}
  0x3b   :  { %s6145_s25 = scalar_lea.vmem %s6270_s21, 28672  ;;  %p6150_p0 = scmp.lt.s32.totalorder %s6270_s21, %s6270_s21 }
  0x3c   :  { %p6146_p13 = scmp.ne.s32.totalorder %s6270_s21, %s6145_s25  ;;  %p6151_p1 = scmp.lt.s32.totalorder %s6145_s25, %s6145_s25 }
  0x3e   :  { %p6152_p2 = por %p6151_p1, %p6150_p0 }
  0x40   :  { %p6153_p3 = pnand %p6152_p2, %p6146_p13 }
  0x42   :  { %6156 = shalt.err (!%p6153_p3)
}
  0x43   :  { %s6171_s9 = smov 448   ;;  %s6172_s3 = smov 28  }
  0x44   :  { %84 = dma.hbm_to_vmem [thread:$0]  %s6537_s11, 28672, %s6270_s21, [#allocation8], %s6171_s9, %s6171_s9, %s6172_s3  }
  0x45   :  { %6157 = dma.done.wait [#allocation3], 28672  }
  0x46   :  { %6158 = vsyncadd [#allocation3], 4294938624 }
  0x47   :  { %6159 = dma.done.wait [#allocation5], 8192  }
  0x48   :  { %6160 = vsyncadd [#allocation5], 4294959104 }
  0x49   :  { %6161 = dma.done.wait [#allocation8], 28672  }
  0x4a   :  { %6162 = vsyncadd [#allocation8], 4294938624  ;;  %v6173_v0 = vmov 0   ;;  %v5281_v1 = vld [vmem:[#allocation2 + $0x4] ss:$16 sps:$4 sm:$0xff]   ;;  %vm6175_vm0 = vmmov 0  }
  0x4b   :  { %1650 = vmatprep.mubr.bf16.mxu1 %v6173_v0  ;;  %v5283_v2 = vld [vmem:[#allocation2 + $0x604] ss:$16 sps:$4 sm:$0xff]   ;;  %1495 = vmatprep.subr.bf16.mxu0 %v5281_v1  ;;  %v5285_v3 = vld [vmem:[#allocation2] ss:$16 sps:$4 sm:$0xff]   ;;  %v5334_v34 = vld [vmem:[#allocation2 + $0xc] ss:$16 sps:$4 sm:$0xff]  }
  0x4c   :  { %v5286_v4 = vld [vmem:[#allocation2 + $0x600] ss:$16 sps:$4 sm:$0xff]   ;;  %1618 = vmatprep.subr.bf16.mxu1 %v5283_v2  ;;  %v5287_v5 = vld [vmem:[#allocation2 + $0x24] ss:$16 sps:$4 sm:$0xff]   ;;  %1496 = vmatpush1.bf16.msra.mxu0 %v5285_v3  ;;  %v5331_v35 = vld [vmem:[%s6526_s0 + $0x18] ss:$0 sps:$4 sm:$0xff]  }
  0x4d   :  { %1619 = vmatpush1.bf16.msra.mxu1 %v5286_v4  ;;  %v5289_v6 = vld [vmem:[#allocation2 + $0x624] ss:$16 sps:$4 sm:$0xff]   ;;  %v5291_v7 = vld [vmem:[#allocation2 + $0x20] ss:$16 sps:$4 sm:$0xff]   ;;  %1497 = vmatprep.subr.bf16.mxu0 %v5287_v5  ;;  %v5332_v36 = vld [vmem:[#allocation2 + $0x8] ss:$16 sps:$4 sm:$0xff]  }
  0x4e   :  { %v5292_v8 = vld [vmem:[#allocation2 + $0x620] ss:$16 sps:$4 sm:$0xff]   ;;  %1620 = vmatprep.subr.bf16.mxu1 %v5289_v6  ;;  %v5293_v9 = vld [vmem:[#allocation2 + $0x44] ss:$16 sps:$4 sm:$0xff]   ;;  %v5340_v39 = vld [vmem:[#allocation2 + $0x2c] ss:$16 sps:$4 sm:$0xff]  }
  0x4f   :  { %v5295_v10 = vld [vmem:[#allocation2 + $0x644] ss:$16 sps:$4 sm:$0xff]   ;;  %v5297_v11 = vld [vmem:[#allocation2 + $0x40] ss:$16 sps:$4 sm:$0xff]   ;;  %v5338_v40 = vld [vmem:[#allocation2 + $0x28] ss:$16 sps:$4 sm:$0xff]  }
  0x50   :  { %v5298_v12 = vld [vmem:[#allocation2 + $0x640] ss:$16 sps:$4 sm:$0xff]   ;;  %1498 = vmatpush1.bf16.msra.mxu0 %v5291_v7  ;;  %v5299_v13 = vld [vmem:[#allocation2 + $0x64] ss:$16 sps:$4 sm:$0xff]   ;;  %v5346_v43 = vld [vmem:[#allocation2 + $0x4c] ss:$16 sps:$4 sm:$0xff]  }
  0x51   :  { %1621 = vmatpush1.bf16.msra.mxu1 %v5292_v8  ;;  %1499 = vmatprep.subr.bf16.mxu0 %v5293_v9  ;;  %v5301_v14 = vld [vmem:[#allocation2 + $0x664] ss:$16 sps:$4 sm:$0xff]   ;;  %v5303_v15 = vld [vmem:[#allocation2 + $0x60] ss:$16 sps:$4 sm:$0xff]   ;;  %v5344_v44 = vld [vmem:[#allocation2 + $0x48] ss:$16 sps:$4 sm:$0xff]  }
  0x52   :  { %1622 = vmatprep.subr.bf16.mxu1 %v5295_v10  ;;  %v5304_v16 = vld [vmem:[#allocation2 + $0x660] ss:$16 sps:$4 sm:$0xff]   ;;  %v5305_v17 = vld [vmem:[#allocation2 + $0x84] ss:$16 sps:$4 sm:$0xff]   ;;  %v5352_v47 = vld [vmem:[#allocation2 + $0x6c] ss:$16 sps:$4 sm:$0xff]  }
  0x53   :  { %v5307_v18 = vld [vmem:[#allocation2 + $0x684] ss:$16 sps:$4 sm:$0xff]   ;;  %v5309_v19 = vld [vmem:[#allocation2 + $0x80] ss:$16 sps:$4 sm:$0xff]   ;;  %v5350_v48 = vld [vmem:[#allocation2 + $0x68] ss:$16 sps:$4 sm:$0xff]  }
  0x54   :  { %1500 = vmatpush1.bf16.msra.mxu0 %v5297_v11  ;;  %v5310_v20 = vld [vmem:[#allocation2 + $0x680] ss:$16 sps:$4 sm:$0xff]   ;;  %v5311_v21 = vld [vmem:[#allocation2 + $0xa4] ss:$16 sps:$4 sm:$0xff]   ;;  %v5358_v53 = vld [vmem:[#allocation2 + $0x8c] ss:$16 sps:$4 sm:$0xff]  }
  0x55   :  { %1623 = vmatpush1.bf16.msra.mxu1 %v5298_v12  ;;  %1501 = vmatprep.subr.bf16.mxu0 %v5299_v13  ;;  %v5313_v22 = vld [vmem:[#allocation2 + $0x6a4] ss:$16 sps:$4 sm:$0xff]   ;;  %v5315_v23 = vld [vmem:[#allocation2 + $0xa0] ss:$16 sps:$4 sm:$0xff]   ;;  %v5356_v54 = vld [vmem:[#allocation2 + $0x88] ss:$16 sps:$4 sm:$0xff]  }
  0x56   :  { %1624 = vmatprep.subr.bf16.mxu1 %v5301_v14  ;;  %v5316_v24 = vld [vmem:[#allocation2 + $0x6a0] ss:$16 sps:$4 sm:$0xff]   ;;  %v5317_v25 = vld [vmem:[#allocation2 + $0xc4] ss:$16 sps:$4 sm:$0xff]   ;;  %v5364_v57 = vld [vmem:[#allocation2 + $0xac] ss:$16 sps:$4 sm:$0xff]  }
  0x57   :  { %v5319_v26 = vld [vmem:[#allocation2 + $0x6c4] ss:$16 sps:$4 sm:$0xff]   ;;  %v5321_v27 = vld [vmem:[#allocation2 + $0xc0] ss:$16 sps:$4 sm:$0xff]   ;;  %v5362_v58 = vld [vmem:[#allocation2 + $0xa8] ss:$16 sps:$4 sm:$0xff]  }
  0x58   :  { %1502 = vmatpush1.bf16.msra.mxu0 %v5303_v15  ;;  %v5322_v28 = vld [vmem:[#allocation2 + $0x6c0] ss:$16 sps:$4 sm:$0xff]   ;;  %v5323_v29 = vld [vmem:[#allocation2 + $0xe4] ss:$16 sps:$4 sm:$0xff]   ;;  %v5370_v61 = vld [vmem:[#allocation2 + $0xcc] ss:$16 sps:$4 sm:$0xff]  }
  0x59   :  { %1625 = vmatpush1.bf16.msra.mxu1 %v5304_v16  ;;  %1503 = vmatprep.subr.bf16.mxu0 %v5305_v17  ;;  %v5325_v30 = vld [vmem:[#allocation2 + $0x6e4] ss:$16 sps:$4 sm:$0xff]   ;;  %v5327_v31 = vld [vmem:[#allocation2 + $0xe0] ss:$16 sps:$4 sm:$0xff]   ;;  %v5368_v62 = vld [vmem:[#allocation2 + $0xc8] ss:$16 sps:$4 sm:$0xff]  }
  0x5a   :  { %1626 = vmatprep.subr.bf16.mxu1 %v5307_v18  ;;  %v5328_v32 = vld [vmem:[#allocation2 + $0x6e0] ss:$16 sps:$4 sm:$0xff]   ;;  %v5329_v33 = vld [vmem:[#allocation2 + $0x104] ss:$16 sps:$4 sm:$0xff]   ;;  %v5376_v2 = vld [vmem:[#allocation2 + $0xec] ss:$16 sps:$4 sm:$0xff]  }
  0x5b   :  { %v5335_v37 = vld [vmem:[#allocation2 + $0x100] ss:$16 sps:$4 sm:$0xff]   ;;  %v5336_v38 = vld [vmem:[#allocation2 + $0x124] ss:$16 sps:$4 sm:$0xff]   ;;  %v5374_v3 = vld [vmem:[#allocation2 + $0xe8] ss:$16 sps:$4 sm:$0xff]  }
  0x5c   :  { %1504 = vmatpush1.bf16.msra.mxu0 %v5309_v19  ;;  %v5341_v41 = vld [vmem:[#allocation2 + $0x120] ss:$16 sps:$4 sm:$0xff]   ;;  %v5342_v42 = vld [vmem:[#allocation2 + $0x144] ss:$16 sps:$4 sm:$0xff]   ;;  %v5385_v6 = vld [vmem:[#allocation2 + $0x10c] ss:$16 sps:$4 sm:$0xff]  }
  0x5d   :  { %1627 = vmatpush1.bf16.msra.mxu1 %v5310_v20  ;;  %1505 = vmatprep.subr.bf16.mxu0 %v5311_v21  ;;  %v5347_v45 = vld [vmem:[#allocation2 + $0x140] ss:$16 sps:$4 sm:$0xff]   ;;  %v5348_v46 = vld [vmem:[#allocation2 + $0x164] ss:$16 sps:$4 sm:$0xff]   ;;  %v5383_v9 = vld [vmem:[#allocation2 + $0x108] ss:$16 sps:$4 sm:$0xff]  }
  0x5e   :  { %1628 = vmatprep.subr.bf16.mxu1 %v5313_v22  ;;  %v100_v49 = vld [vmem:[%s6526_s0] sm:$0xff]  ;;  %v5391_v11 = vld [vmem:[#allocation2 + $0x12c] ss:$16 sps:$4 sm:$0xff]   ;;  %v5389_v13 = vld [vmem:[#allocation2 + $0x128] ss:$16 sps:$4 sm:$0xff]  }
  0x5f   :  { %v5353_v50 = vld [vmem:[#allocation2 + $0x160] ss:$16 sps:$4 sm:$0xff]   ;;  %v5354_v51 = vld [vmem:[#allocation2 + $0x184] ss:$16 sps:$4 sm:$0xff]   ;;  %v4534_v52 = vcombine.high %v100_v49, %v100_v49  ;;  %v6308_v7 = vcombine.low %v100_v49, %v100_v49  ;;  %v5397_v15 = vld [vmem:[#allocation2 + $0x14c] ss:$16 sps:$4 sm:$0xff]  }
  0x60   :  { %1506 = vmatpush1.bf16.msra.mxu0 %v5315_v23  ;;  %v5359_v55 = vld [vmem:[#allocation2 + $0x180] ss:$16 sps:$4 sm:$0xff]   ;;  %v5360_v56 = vld [vmem:[#allocation2 + $0x1a4] ss:$16 sps:$4 sm:$0xff]   ;;  %v5395_v17 = vld [vmem:[#allocation2 + $0x148] ss:$16 sps:$4 sm:$0xff]  }
  0x61   :  { %1629 = vmatpush1.bf16.msra.mxu1 %v5316_v24  ;;  %1507 = vmatprep.subr.bf16.mxu0 %v5317_v25  ;;  %v5365_v59 = vld [vmem:[#allocation2 + $0x1a0] ss:$16 sps:$4 sm:$0xff]   ;;  %v5366_v60 = vld [vmem:[#allocation2 + $0x1c4] ss:$16 sps:$4 sm:$0xff]   ;;  %v5403_v19 = vld [vmem:[#allocation2 + $0x16c] ss:$16 sps:$4 sm:$0xff]  }
  0x62   :  { %1630 = vmatprep.subr.bf16.mxu1 %v5319_v26  ;;  %1527 = vmatprep.mubr.bf16.mxu0 %v4534_v52  ;;  %v5371_v63 = vld [vmem:[#allocation2 + $0x1c0] ss:$16 sps:$4 sm:$0xff]   ;;  %v5372_v1 = vld [vmem:[#allocation2 + $0x1e4] ss:$16 sps:$4 sm:$0xff]   ;;  %v5401_v21 = vld [vmem:[#allocation2 + $0x168] ss:$16 sps:$4 sm:$0xff]  }
  0x63   :  { %v5377_v4 = vld [vmem:[#allocation2 + $0x1e0] ss:$16 sps:$4 sm:$0xff]   ;;  %v5382_v5 = vld [vmem:[#allocation2 + $0x204] ss:$16 sps:$4 sm:$0xff]   ;;  %v5409_v23 = vld [vmem:[#allocation2 + $0x18c] ss:$16 sps:$4 sm:$0xff]  }
  0x64   :  { %1508 = vmatpush1.bf16.msra.mxu0 %v5321_v27  ;;  %v5380_v8 = vld [vmem:[#allocation2 + $0x200] ss:$16 sps:$4 sm:$0xff]   ;;  %v5388_v10 = vld [vmem:[#allocation2 + $0x224] ss:$16 sps:$4 sm:$0xff]   ;;  %v5407_v25 = vld [vmem:[#allocation2 + $0x188] ss:$16 sps:$4 sm:$0xff]  }
  0x65   :  { %1631 = vmatpush1.bf16.msra.mxu1 %v5322_v28  ;;  %1509 = vmatprep.subr.bf16.mxu0 %v5323_v29  ;;  %v5386_v12 = vld [vmem:[#allocation2 + $0x220] ss:$16 sps:$4 sm:$0xff]   ;;  %v5394_v14 = vld [vmem:[#allocation2 + $0x244] ss:$16 sps:$4 sm:$0xff]   ;;  %v5415_v27 = vld [vmem:[#allocation2 + $0x1ac] ss:$16 sps:$4 sm:$0xff]  }
  0x66   :  { %1632 = vmatprep.subr.bf16.mxu1 %v5325_v30  ;;  %v5392_v16 = vld [vmem:[#allocation2 + $0x240] ss:$16 sps:$4 sm:$0xff]   ;;  %v5400_v18 = vld [vmem:[#allocation2 + $0x264] ss:$16 sps:$4 sm:$0xff]   ;;  %v5413_v29 = vld [vmem:[#allocation2 + $0x1a8] ss:$16 sps:$4 sm:$0xff]  }
  0x67   :  { %v5398_v20 = vld [vmem:[#allocation2 + $0x260] ss:$16 sps:$4 sm:$0xff]   ;;  %v5406_v22 = vld [vmem:[#allocation2 + $0x284] ss:$16 sps:$4 sm:$0xff]   ;;  %v5445_v49 = vld [vmem:[#allocation2 + $0x24c] ss:$16 sps:$4 sm:$0xff]  }
  0x68   :  { %1510 = vmatpush1.bf16.msra.mxu0 %v5327_v31  ;;  %v5404_v24 = vld [vmem:[#allocation2 + $0x280] ss:$16 sps:$4 sm:$0xff]   ;;  %v5412_v26 = vld [vmem:[#allocation2 + $0x2a4] ss:$16 sps:$4 sm:$0xff]   ;;  %v5421_v31 = vld [vmem:[#allocation2 + $0x1cc] ss:$16 sps:$4 sm:$0xff]  }
  0x69   :  { %1633 = vmatpush1.bf16.msra.mxu1 %v5328_v32  ;;  %1511 = vmatprep.subr.bf16.mxu0 %v5329_v33  ;;  %v5410_v28 = vld [vmem:[#allocation2 + $0x2a0] ss:$16 sps:$4 sm:$0xff]   ;;  %v5418_v30 = vld [vmem:[#allocation2 + $0x2c4] ss:$16 sps:$4 sm:$0xff]   ;;  %v6314_v32 = vld [vmem:[%s6526_s0 + $0x8] sm:$0xff] }
  0x6a   :  { %1659 = vmatprep.subr.bf16.mxu1 %v5334_v34  ;;  %v5416_v33 = vld [vmem:[#allocation2 + $0x2c0] ss:$16 sps:$4 sm:$0xff]   ;;  %v5419_v34 = vld [vmem:[#allocation2 + $0x1c8] ss:$16 sps:$4 sm:$0xff]  }
  0x6c   :  { %1651 = vmatmul.mubr.bf16.vlgmr.msra.gmra.mrb[0].mxu1 %v5331_v35  ;;  %1512 = vmatpush1.bf16.msra.mxu0 %v5335_v37  ;;  %v4536_v35 = vcombine.high %v6314_v32, %v6314_v32  ;;  %v5427_v37 = vld [vmem:[#allocation2 + $0x1ec] ss:$16 sps:$4 sm:$0xff]  }
  0x6d   :  { %1660 = vmatpush1.bf16.msra.mxu1 %v5332_v36  ;;  %1513 = vmatprep.subr.bf16.mxu0 %v5336_v38  ;;  %v5424_v36 = vld [vmem:[#allocation2 + $0x2e4] ss:$16 sps:$4 sm:$0xff]   ;;  %v5422_v38 = vld [vmem:[#allocation2 + $0x2e0] ss:$16 sps:$4 sm:$0xff]  }
  0x6e   :  { %1661 = vmatprep.subr.bf16.mxu1 %v5340_v39  ;;  %1691 = vmatprep.mubr.bf16.mxu1 %v4534_v52  ;;  %v5425_v39 = vld [vmem:[#allocation2 + $0x1e8] ss:$16 sps:$4 sm:$0xff]   ;;  %v5448_v52 = vld [vmem:[#allocation2 + $0x364] ss:$16 sps:$4 sm:$0xff]  }
  0x70   :  { %1514 = vmatpush1.bf16.msra.mxu0 %v5341_v41  ;;  %v5433_v41 = vld [vmem:[#allocation2 + $0x20c] ss:$16 sps:$4 sm:$0xff]  }
  0x71   :  { %1662 = vmatpush1.bf16.msra.mxu1 %v5338_v40  ;;  %1515 = vmatprep.subr.bf16.mxu0 %v5342_v42  ;;  %v5430_v40 = vld [vmem:[#allocation2 + $0x304] ss:$16 sps:$4 sm:$0xff]   ;;  %v5428_v42 = vld [vmem:[#allocation2 + $0x300] ss:$16 sps:$4 sm:$0xff]  }
  0x72   :  { %1663 = vmatprep.subr.bf16.mxu1 %v5346_v43  ;;  %v5431_v43 = vld [vmem:[#allocation2 + $0x208] ss:$16 sps:$4 sm:$0xff]  }
  0x74   :  { %1516 = vmatpush1.bf16.msra.mxu0 %v5347_v45  ;;  %v5439_v45 = vld [vmem:[#allocation2 + $0x22c] ss:$16 sps:$4 sm:$0xff]  }
  0x75   :  { %1664 = vmatpush1.bf16.msra.mxu1 %v5344_v44  ;;  %1517 = vmatprep.subr.bf16.mxu0 %v5348_v46  ;;  %v5436_v44 = vld [vmem:[#allocation2 + $0x324] ss:$16 sps:$4 sm:$0xff]   ;;  %v5434_v46 = vld [vmem:[#allocation2 + $0x320] ss:$16 sps:$4 sm:$0xff]  }
  0x76   :  { %1665 = vmatprep.subr.bf16.mxu1 %v5352_v47  ;;  %v5437_v47 = vld [vmem:[#allocation2 + $0x228] ss:$16 sps:$4 sm:$0xff]  }
  0x78   :  { %1518 = vmatpush1.bf16.msra.mxu0 %v5353_v50  ;;  %v5440_v50 = vld [vmem:[#allocation2 + $0x340] ss:$16 sps:$4 sm:$0xff]  }
  0x79   :  { %1666 = vmatpush1.bf16.msra.mxu1 %v5350_v48  ;;  %1519 = vmatprep.subr.bf16.mxu0 %v5354_v51  ;;  %v5442_v48 = vld [vmem:[#allocation2 + $0x344] ss:$16 sps:$4 sm:$0xff]   ;;  %v5443_v51 = vld [vmem:[#allocation2 + $0x248] ss:$16 sps:$4 sm:$0xff]  }
  0x7a   :  { %1667 = vmatprep.subr.bf16.mxu1 %v5358_v53  ;;  %v5451_v53 = vld [vmem:[#allocation2 + $0x26c] ss:$16 sps:$4 sm:$0xff]  }
  0x7c   :  { %1520 = vmatpush1.bf16.msra.mxu0 %v5359_v55  ;;  %v5449_v55 = vld [vmem:[#allocation2 + $0x268] ss:$16 sps:$4 sm:$0xff]  }
  0x7d   :  { %1668 = vmatpush1.bf16.msra.mxu1 %v5356_v54  ;;  %1521 = vmatprep.subr.bf16.mxu0 %v5360_v56  ;;  %v5446_v54 = vld [vmem:[#allocation2 + $0x360] ss:$16 sps:$4 sm:$0xff]   ;;  %v5454_v56 = vld [vmem:[#allocation2 + $0x384] ss:$16 sps:$4 sm:$0xff]  }
  0x7e   :  { %1669 = vmatprep.subr.bf16.mxu1 %v5364_v57  ;;  %v5457_v57 = vld [vmem:[#allocation2 + $0x28c] ss:$16 sps:$4 sm:$0xff]  }
  0x80   :  { %1522 = vmatpush1.bf16.msra.mxu0 %v5365_v59  ;;  %v5455_v59 = vld [vmem:[#allocation2 + $0x288] ss:$16 sps:$4 sm:$0xff]  }
  0x81   :  { %1670 = vmatpush1.bf16.msra.mxu1 %v5362_v58  ;;  %1523 = vmatprep.subr.bf16.mxu0 %v5366_v60  ;;  %v5452_v58 = vld [vmem:[#allocation2 + $0x380] ss:$16 sps:$4 sm:$0xff]   ;;  %v5460_v60 = vld [vmem:[#allocation2 + $0x3a4] ss:$16 sps:$4 sm:$0xff]  }
  0x82   :  { %1671 = vmatprep.subr.bf16.mxu1 %v5370_v61  ;;  %v5463_v61 = vld [vmem:[#allocation2 + $0x2ac] ss:$16 sps:$4 sm:$0xff]  }
  0x84   :  { %1524 = vmatpush1.bf16.msra.mxu0 %v5371_v63  ;;  %v5461_v63 = vld [vmem:[#allocation2 + $0x2a8] ss:$16 sps:$4 sm:$0xff]  }
  0x85   :  { %1672 = vmatpush1.bf16.msra.mxu1 %v5368_v62  ;;  %1525 = vmatprep.subr.bf16.mxu0 %v5372_v1  ;;  %v5458_v62 = vld [vmem:[#allocation2 + $0x3a0] ss:$16 sps:$4 sm:$0xff]   ;;  %v5466_v1 = vld [vmem:[#allocation2 + $0x3c4] ss:$16 sps:$4 sm:$0xff]  }
  0x86   :  { %1673 = vmatprep.subr.bf16.mxu1 %v5376_v2  ;;  %v5469_v2 = vld [vmem:[#allocation2 + $0x2cc] ss:$16 sps:$4 sm:$0xff]  }
  0x88   :  { %1526 = vmatpush1.bf16.msra.mxu0 %v5377_v4  ;;  %v5467_v4 = vld [vmem:[#allocation2 + $0x2c8] ss:$16 sps:$4 sm:$0xff]  }
  0x89   :  { %1674 = vmatpush1.bf16.msra.mxu1 %v5374_v3  ;;  %1536 = vmatprep.subr.bf16.mxu0 %v5382_v5  ;;  %v5464_v3 = vld [vmem:[#allocation2 + $0x3c0] ss:$16 sps:$4 sm:$0xff]   ;;  %v5472_v5 = vld [vmem:[#allocation2 + $0x3e4] ss:$16 sps:$4 sm:$0xff]  }
  0x8a   :  { %1675 = vmatprep.subr.bf16.mxu1 %v5385_v6  ;;  %v5475_v6 = vld [vmem:[#allocation2 + $0x2ec] ss:$16 sps:$4 sm:$0xff]  }
  0x8b   :  { %1528 = vmatmul.mubr.bf16.vlgmr.msra.gmra.mrb[0].mxu0 %v6308_v7 }
  0x8c   :  { %1537 = vmatpush1.bf16.msra.mxu0 %v5380_v8  ;;  %1568 = vmatprep.mubr.bf16.mxu0 %v4536_v35  ;;  %v5473_v8 = vld [vmem:[#allocation2 + $0x2e8] ss:$16 sps:$4 sm:$0xff]  }
  0x8d   :  { %1676 = vmatpush1.bf16.msra.mxu1 %v5383_v9  ;;  %1538 = vmatprep.subr.bf16.mxu0 %v5388_v10  ;;  %v5480_v9 = vld [vmem:[#allocation2 + $0x404] ss:$16 sps:$4 sm:$0xff]   ;;  %v5483_v10 = vld [vmem:[#allocation2 + $0x30c] ss:$16 sps:$4 sm:$0xff]  }
  0x8e   :  { %1677 = vmatprep.subr.bf16.mxu1 %v5391_v11  ;;  %v6321_v11 = vcombine.low %v6314_v32, %v6314_v32  ;;  %v5510_v32 = vld [vmem:[#allocation2 + $0x4a4] ss:$16 sps:$4 sm:$0xff]  }
  0x90   :  { %1539 = vmatpush1.bf16.msra.mxu0 %v5386_v12  ;;  %v5478_v12 = vld [vmem:[#allocation2 + $0x400] ss:$16 sps:$4 sm:$0xff]  }
  0x91   :  { %1678 = vmatpush1.bf16.msra.mxu1 %v5389_v13  ;;  %1540 = vmatprep.subr.bf16.mxu0 %v5394_v14  ;;  %v5481_v13 = vld [vmem:[#allocation2 + $0x308] ss:$16 sps:$4 sm:$0xff]   ;;  %v5486_v14 = vld [vmem:[#allocation2 + $0x424] ss:$16 sps:$4 sm:$0xff]  }
  0x92   :  { %1679 = vmatprep.subr.bf16.mxu1 %v5397_v15  ;;  %v5489_v15 = vld [vmem:[#allocation2 + $0x32c] ss:$16 sps:$4 sm:$0xff]  }
  0x94   :  { %1541 = vmatpush1.bf16.msra.mxu0 %v5392_v16  ;;  %v6326_v16 = vld [vmem:[%s6526_s0 + $0x10] sm:$0xff] }
  0x95   :  { %1680 = vmatpush1.bf16.msra.mxu1 %v5395_v17  ;;  %1542 = vmatprep.subr.bf16.mxu0 %v5400_v18  ;;  %v6330_v17 = vcombine.high %v6326_v16, %v6326_v16  ;;  %v5484_v18 = vld [vmem:[#allocation2 + $0x420] ss:$16 sps:$4 sm:$0xff]  }
  0x96   :  { %1681 = vmatprep.subr.bf16.mxu1 %v5403_v19  ;;  %v5487_v19 = vld [vmem:[#allocation2 + $0x328] ss:$16 sps:$4 sm:$0xff]  }
  0x98   :  { %1543 = vmatpush1.bf16.msra.mxu0 %v5398_v20  ;;  %v5492_v20 = vld [vmem:[#allocation2 + $0x444] ss:$16 sps:$4 sm:$0xff]  }
  0x99   :  { %1682 = vmatpush1.bf16.msra.mxu1 %v5401_v21  ;;  %1544 = vmatprep.subr.bf16.mxu0 %v5406_v22  ;;  %v5495_v21 = vld [vmem:[#allocation2 + $0x34c] ss:$16 sps:$4 sm:$0xff]   ;;  %v5490_v22 = vld [vmem:[#allocation2 + $0x440] ss:$16 sps:$4 sm:$0xff]  }
  0x9a   :  { %1683 = vmatprep.subr.bf16.mxu1 %v5409_v23  ;;  %v5493_v23 = vld [vmem:[#allocation2 + $0x348] ss:$16 sps:$4 sm:$0xff]  }
  0x9c   :  { %1545 = vmatpush1.bf16.msra.mxu0 %v5404_v24  ;;  %v5498_v24 = vld [vmem:[#allocation2 + $0x464] ss:$16 sps:$4 sm:$0xff]  }
  0x9d   :  { %1684 = vmatpush1.bf16.msra.mxu1 %v5407_v25  ;;  %1546 = vmatprep.subr.bf16.mxu0 %v5412_v26  ;;  %v5501_v25 = vld [vmem:[#allocation2 + $0x36c] ss:$16 sps:$4 sm:$0xff]   ;;  %v5496_v26 = vld [vmem:[#allocation2 + $0x460] ss:$16 sps:$4 sm:$0xff]  }
  0x9e   :  { %1685 = vmatprep.subr.bf16.mxu1 %v5415_v27  ;;  %v5499_v27 = vld [vmem:[#allocation2 + $0x368] ss:$16 sps:$4 sm:$0xff]  }
  0xa0   :  { %1547 = vmatpush1.bf16.msra.mxu0 %v5410_v28  ;;  %v5504_v28 = vld [vmem:[#allocation2 + $0x484] ss:$16 sps:$4 sm:$0xff]  }
  0xa1   :  { %1686 = vmatpush1.bf16.msra.mxu1 %v5413_v29  ;;  %1548 = vmatprep.subr.bf16.mxu0 %v5418_v30  ;;  %v5507_v29 = vld [vmem:[#allocation2 + $0x38c] ss:$16 sps:$4 sm:$0xff]   ;;  %v5502_v30 = vld [vmem:[#allocation2 + $0x480] ss:$16 sps:$4 sm:$0xff]  }
  0xa2   :  { %1687 = vmatprep.subr.bf16.mxu1 %v5421_v31  ;;  %v5505_v31 = vld [vmem:[#allocation2 + $0x388] ss:$16 sps:$4 sm:$0xff]  }
  0xa4   :  { %1549 = vmatpush1.bf16.msra.mxu0 %v5416_v33  ;;  %v5513_v33 = vld [vmem:[#allocation2 + $0x3ac] ss:$16 sps:$4 sm:$0xff]  }
  0xa5   :  { %1688 = vmatpush1.bf16.msra.mxu1 %v5419_v34  ;;  %1550 = vmatprep.subr.bf16.mxu0 %v5424_v36  ;;  %v5508_v34 = vld [vmem:[#allocation2 + $0x4a0] ss:$16 sps:$4 sm:$0xff]   ;;  %v5516_v36 = vld [vmem:[#allocation2 + $0x4c4] ss:$16 sps:$4 sm:$0xff]  }
  0xa6   :  { %1689 = vmatprep.subr.bf16.mxu1 %v5427_v37  ;;  %v5519_v37 = vld [vmem:[#allocation2 + $0x3cc] ss:$16 sps:$4 sm:$0xff]  }
  0xa8   :  { %1551 = vmatpush1.bf16.msra.mxu0 %v5422_v38  ;;  %v5514_v38 = vld [vmem:[#allocation2 + $0x4c0] ss:$16 sps:$4 sm:$0xff]  }
  0xa9   :  { %1690 = vmatpush1.bf16.msra.mxu1 %v5425_v39  ;;  %1552 = vmatprep.subr.bf16.mxu0 %v5430_v40  ;;  %v5517_v39 = vld [vmem:[#allocation2 + $0x3c8] ss:$16 sps:$4 sm:$0xff]   ;;  %v5522_v40 = vld [vmem:[#allocation2 + $0x4e4] ss:$16 sps:$4 sm:$0xff]  }
  0xaa   :  { %1700 = vmatprep.subr.bf16.mxu1 %v5433_v41  ;;  %v5525_v41 = vld [vmem:[#allocation2 + $0x3ec] ss:$16 sps:$4 sm:$0xff]  }
  0xac   :  { %1692 = vmatmul.mubr.bf16.vlgmr.msra.gmra.mrb[4].mxu1 %v6308_v7  ;;  %1553 = vmatpush1.bf16.msra.mxu0 %v5428_v42  ;;  %v5470_v7 = vld [vmem:[#allocation2 + $0x3e0] ss:$16 sps:$4 sm:$0xff]  }
  0xad   :  { %1701 = vmatpush1.bf16.msra.mxu1 %v5431_v43  ;;  %1554 = vmatprep.subr.bf16.mxu0 %v5436_v44  ;;  %v5520_v42 = vld [vmem:[#allocation2 + $0x4e0] ss:$16 sps:$4 sm:$0xff]   ;;  %v5523_v43 = vld [vmem:[#allocation2 + $0x3e8] ss:$16 sps:$4 sm:$0xff]   ;;  %v5528_v44 = vld [vmem:[#allocation2 + $0x504] ss:$16 sps:$4 sm:$0xff]  }
  0xae   :  { %1702 = vmatprep.subr.bf16.mxu1 %v5439_v45  ;;  %1732 = vmatprep.mubr.bf16.mxu1 %v4536_v35  ;;  %v5511_v35 = vld [vmem:[#allocation2 + $0x3a8] ss:$16 sps:$4 sm:$0xff]   ;;  %v5531_v45 = vld [vmem:[#allocation2 + $0x40c] ss:$16 sps:$4 sm:$0xff]  }
  0xb0   :  { %1555 = vmatpush1.bf16.msra.mxu0 %v5434_v46  ;;  %v5526_v46 = vld [vmem:[#allocation2 + $0x500] ss:$16 sps:$4 sm:$0xff]  }
  0xb1   :  { %1703 = vmatpush1.bf16.msra.mxu1 %v5437_v47  ;;  %1556 = vmatprep.subr.bf16.mxu0 %v5442_v48  ;;  %v5529_v47 = vld [vmem:[#allocation2 + $0x408] ss:$16 sps:$4 sm:$0xff]   ;;  %v5534_v48 = vld [vmem:[#allocation2 + $0x524] ss:$16 sps:$4 sm:$0xff]  }
  0xb2   :  { %1704 = vmatprep.subr.bf16.mxu1 %v5445_v49  ;;  %v5537_v49 = vld [vmem:[#allocation2 + $0x42c] ss:$16 sps:$4 sm:$0xff]  }
  0xb4   :  { %1557 = vmatpush1.bf16.msra.mxu0 %v5440_v50  ;;  %v5532_v50 = vld [vmem:[#allocation2 + $0x520] ss:$16 sps:$4 sm:$0xff]  }
  0xb5   :  { %1705 = vmatpush1.bf16.msra.mxu1 %v5443_v51  ;;  %1558 = vmatprep.subr.bf16.mxu0 %v5448_v52  ;;  %v5535_v51 = vld [vmem:[#allocation2 + $0x428] ss:$16 sps:$4 sm:$0xff]   ;;  %v5540_v52 = vld [vmem:[#allocation2 + $0x544] ss:$16 sps:$4 sm:$0xff]  }
  0xb6   :  { %1706 = vmatprep.subr.bf16.mxu1 %v5451_v53  ;;  %v5543_v53 = vld [vmem:[#allocation2 + $0x44c] ss:$16 sps:$4 sm:$0xff]  }
  0xb8   :  { %1559 = vmatpush1.bf16.msra.mxu0 %v5446_v54  ;;  %v5538_v54 = vld [vmem:[#allocation2 + $0x540] ss:$16 sps:$4 sm:$0xff]  }
  0xb9   :  { %1707 = vmatpush1.bf16.msra.mxu1 %v5449_v55  ;;  %1560 = vmatprep.subr.bf16.mxu0 %v5454_v56  ;;  %v5541_v55 = vld [vmem:[#allocation2 + $0x448] ss:$16 sps:$4 sm:$0xff]   ;;  %v5546_v56 = vld [vmem:[#allocation2 + $0x564] ss:$16 sps:$4 sm:$0xff]  }
  0xba   :  { %1708 = vmatprep.subr.bf16.mxu1 %v5457_v57  ;;  %v5549_v57 = vld [vmem:[#allocation2 + $0x46c] ss:$16 sps:$4 sm:$0xff]  }
  0xbc   :  { %1561 = vmatpush1.bf16.msra.mxu0 %v5452_v58  ;;  %v5544_v58 = vld [vmem:[#allocation2 + $0x560] ss:$16 sps:$4 sm:$0xff]  }
  0xbd   :  { %1709 = vmatpush1.bf16.msra.mxu1 %v5455_v59  ;;  %1562 = vmatprep.subr.bf16.mxu0 %v5460_v60  ;;  %v5547_v59 = vld [vmem:[#allocation2 + $0x468] ss:$16 sps:$4 sm:$0xff]   ;;  %v5552_v60 = vld [vmem:[#allocation2 + $0x584] ss:$16 sps:$4 sm:$0xff]  }
  0xbe   :  { %1710 = vmatprep.subr.bf16.mxu1 %v5463_v61  ;;  %v5555_v61 = vld [vmem:[#allocation2 + $0x48c] ss:$16 sps:$4 sm:$0xff]  }
  0xc0   :  { %1563 = vmatpush1.bf16.msra.mxu0 %v5458_v62  ;;  %v5550_v62 = vld [vmem:[#allocation2 + $0x580] ss:$16 sps:$4 sm:$0xff]  }
  0xc1   :  { %1711 = vmatpush1.bf16.msra.mxu1 %v5461_v63  ;;  %1564 = vmatprep.subr.bf16.mxu0 %v5466_v1  ;;  %v5553_v63 = vld [vmem:[#allocation2 + $0x488] ss:$16 sps:$4 sm:$0xff]   ;;  %v5558_v1 = vld [vmem:[#allocation2 + $0x5a4] ss:$16 sps:$4 sm:$0xff]  }
  0xc2   :  { %1712 = vmatprep.subr.bf16.mxu1 %v5469_v2  ;;  %v5561_v2 = vld [vmem:[#allocation2 + $0x4ac] ss:$16 sps:$4 sm:$0xff]  }
  0xc4   :  { %1565 = vmatpush1.bf16.msra.mxu0 %v5464_v3  ;;  %v5556_v3 = vld [vmem:[#allocation2 + $0x5a0] ss:$16 sps:$4 sm:$0xff]  }
  0xc5   :  { %1713 = vmatpush1.bf16.msra.mxu1 %v5467_v4  ;;  %1566 = vmatprep.subr.bf16.mxu0 %v5472_v5  ;;  %v5559_v4 = vld [vmem:[#allocation2 + $0x4a8] ss:$16 sps:$4 sm:$0xff]   ;;  %v5564_v5 = vld [vmem:[#allocation2 + $0x5c4] ss:$16 sps:$4 sm:$0xff]  }
  0xc6   :  { %1714 = vmatprep.subr.bf16.mxu1 %v5475_v6  ;;  %v5567_v6 = vld [vmem:[#allocation2 + $0x4cc] ss:$16 sps:$4 sm:$0xff]  }
  0xc8   :  { %1567 = vmatpush1.bf16.msra.mxu0 %v5470_v7  ;;  %v5562_v7 = vld [vmem:[#allocation2 + $0x5c0] ss:$16 sps:$4 sm:$0xff]  }
  0xc9   :  { %1715 = vmatpush1.bf16.msra.mxu1 %v5473_v8  ;;  %1577 = vmatprep.subr.bf16.mxu0 %v5480_v9  ;;  %v5565_v8 = vld [vmem:[#allocation2 + $0x4c8] ss:$16 sps:$4 sm:$0xff]   ;;  %v5570_v9 = vld [vmem:[#allocation2 + $0x5e4] ss:$16 sps:$4 sm:$0xff]  }
  0xca   :  { %1716 = vmatprep.subr.bf16.mxu1 %v5483_v10  ;;  %v5573_v10 = vld [vmem:[#allocation2 + $0x4ec] ss:$16 sps:$4 sm:$0xff]  }
  0xcb   :  { %1569 = vmatmul.mubr.bf16.vlgmr.msra.gmra.mrb[0].mxu0 %v6321_v11 }
  0xcc   :  { %1578 = vmatpush1.bf16.msra.mxu0 %v5478_v12  ;;  %1609 = vmatprep.mubr.bf16.mxu0 %v6330_v17  ;;  %v5571_v12 = vld [vmem:[#allocation2 + $0x4e8] ss:$16 sps:$4 sm:$0xff]  }
  0xcd   :  { %1717 = vmatpush1.bf16.msra.mxu1 %v5481_v13  ;;  %1579 = vmatprep.subr.bf16.mxu0 %v5486_v14  ;;  %v5578_v13 = vld [vmem:[#allocation2 + $0x50c] ss:$16 sps:$4 sm:$0xff]   ;;  %v5624_v14 = vld [vmem:[#allocation4 + $0x40] sm:$0xff]  }
  0xce   :  { %1718 = vmatprep.subr.bf16.mxu1 %v5489_v15  ;;  %v5576_v15 = vld [vmem:[#allocation2 + $0x508] ss:$16 sps:$4 sm:$0xff]  }
  0xd0   :  { %1580 = vmatpush1.bf16.msra.mxu0 %v5484_v18  ;;  %v4537_v18 = vcombine.low %v6326_v16, %v6326_v16  ;;  %v5585_v16 = vld [vmem:[#allocation2 + $0x568] ss:$16 sps:$4 sm:$0xff]  }
  0xd1   :  { %1719 = vmatpush1.bf16.msra.mxu1 %v5487_v19  ;;  %1581 = vmatprep.subr.bf16.mxu0 %v5492_v20  ;;  %v5581_v19 = vld [vmem:[#allocation2 + $0x52c] ss:$16 sps:$4 sm:$0xff]  }
  0xd2   :  { %1720 = vmatprep.subr.bf16.mxu1 %v5495_v21  ;;  %v5626_v20 = vld [vmem:[#allocation4 + $0x48] sm:$0xff]  }
  0xd3   :  { %v5579_v21 = vld [vmem:[#allocation2 + $0x528] ss:$16 sps:$4 sm:$0xff]  }
  0xd4   :  { %1582 = vmatpush1.bf16.msra.mxu0 %v5490_v22  ;;  %v5627_v22 = vld [vmem:[#allocation4 + $0x8] sm:$0xff]  }
  0xd5   :  { %1721 = vmatpush1.bf16.msra.mxu1 %v5493_v23  ;;  %1583 = vmatprep.subr.bf16.mxu0 %v5498_v24  ;;  %v5584_v23 = vld [vmem:[#allocation2 + $0x54c] ss:$16 sps:$4 sm:$0xff]   ;;  %v5628_v24 = vld [vmem:[#allocation4 + $0x50] sm:$0xff]  }
  0xd6   :  { %1722 = vmatprep.subr.bf16.mxu1 %v5501_v25  ;;  %v5582_v25 = vld [vmem:[#allocation2 + $0x548] ss:$16 sps:$4 sm:$0xff]  }
  0xd8   :  { %1584 = vmatpush1.bf16.msra.mxu0 %v5496_v26  ;;  %v5629_v26 = vld [vmem:[#allocation4 + $0x10] sm:$0xff]  }
  0xd9   :  { %1723 = vmatpush1.bf16.msra.mxu1 %v5499_v27  ;;  %1585 = vmatprep.subr.bf16.mxu0 %v5504_v28  ;;  %v5587_v27 = vld [vmem:[#allocation2 + $0x56c] ss:$16 sps:$4 sm:$0xff]  }
  0xda   :  { %1724 = vmatprep.subr.bf16.mxu1 %v5507_v29  ;;  %v5630_v28 = vld [vmem:[#allocation4 + $0x58] sm:$0xff]  }
  0xdb   :  { %v5631_v29 = vld [vmem:[#allocation4 + $0x18] sm:$0xff]  }
  0xdc   :  { %1586 = vmatpush1.bf16.msra.mxu0 %v5502_v30  ;;  %v5590_v30 = vld [vmem:[#allocation2 + $0x58c] ss:$16 sps:$4 sm:$0xff]  }
  0xdd   :  { %1725 = vmatpush1.bf16.msra.mxu1 %v5505_v31  ;;  %1587 = vmatprep.subr.bf16.mxu0 %v5510_v32  ;;  %v5632_v31 = vld [vmem:[#allocation4 + $0x60] sm:$0xff]   ;;  %v5588_v32 = vld [vmem:[#allocation2 + $0x588] ss:$16 sps:$4 sm:$0xff]  }
  0xde   :  { %1726 = vmatprep.subr.bf16.mxu1 %v5513_v33  ;;  %v5633_v33 = vld [vmem:[#allocation4 + $0x20] sm:$0xff]  }
  0xe0   :  { %1588 = vmatpush1.bf16.msra.mxu0 %v5508_v34  ;;  %v5593_v34 = vld [vmem:[#allocation2 + $0x5ac] ss:$16 sps:$4 sm:$0xff]  }
  0xe1   :  { %1727 = vmatpush1.bf16.msra.mxu1 %v5511_v35  ;;  %1589 = vmatprep.subr.bf16.mxu0 %v5516_v36  ;;  %v5634_v35 = vld [vmem:[#allocation4 + $0x68] sm:$0xff]  }
  0xe2   :  { %1728 = vmatprep.subr.bf16.mxu1 %v5519_v37  ;;  %v5591_v36 = vld [vmem:[#allocation2 + $0x5a8] ss:$16 sps:$4 sm:$0xff]   ;;  %v5596_v37 = vld [vmem:[#allocation2 + $0x5cc] ss:$16 sps:$4 sm:$0xff]  }
  0xe4   :  { %1590 = vmatpush1.bf16.msra.mxu0 %v5514_v38  ;;  %v5594_v38 = vld [vmem:[#allocation2 + $0x5c8] ss:$16 sps:$4 sm:$0xff]  }
  0xe5   :  { %1729 = vmatpush1.bf16.msra.mxu1 %v5517_v39  ;;  %1591 = vmatprep.subr.bf16.mxu0 %v5522_v40  ;;  %v5599_v39 = vld [vmem:[#allocation2 + $0x5ec] ss:$16 sps:$4 sm:$0xff]   ;;  %v5597_v40 = vld [vmem:[#allocation2 + $0x5e8] ss:$16 sps:$4 sm:$0xff]  }
  0xe6   :  { %1730 = vmatprep.subr.bf16.mxu1 %v5525_v41  ;;  %v5602_v41 = vld [vmem:[#allocation2 + $0x60c] ss:$16 sps:$4 sm:$0xff]  }
  0xe8   :  { %1592 = vmatpush1.bf16.msra.mxu0 %v5520_v42  ;;  %v5600_v42 = vld [vmem:[#allocation2 + $0x608] ss:$16 sps:$4 sm:$0xff]  }
  0xe9   :  { %1731 = vmatpush1.bf16.msra.mxu1 %v5523_v43  ;;  %1593 = vmatprep.subr.bf16.mxu0 %v5528_v44  ;;  %v5605_v43 = vld [vmem:[#allocation2 + $0x62c] ss:$16 sps:$4 sm:$0xff]   ;;  %v5603_v44 = vld [vmem:[#allocation2 + $0x628] ss:$16 sps:$4 sm:$0xff]  }
  0xea   :  { %1741 = vmatprep.subr.bf16.mxu1 %v5531_v45  ;;  %v5608_v45 = vld [vmem:[#allocation2 + $0x64c] ss:$16 sps:$4 sm:$0xff]  }
  0xec   :  { %1733 = vmatmul.mubr.bf16.vlgmr.msra.gmra.mrb[4].mxu1 %v6321_v11  ;;  %1594 = vmatpush1.bf16.msra.mxu0 %v5526_v46  ;;  %v5568_v11 = vld [vmem:[#allocation2 + $0x5e0] ss:$16 sps:$4 sm:$0xff]   ;;  %v5606_v46 = vld [vmem:[#allocation2 + $0x648] ss:$16 sps:$4 sm:$0xff]  }
  0xed   :  { %1742 = vmatpush1.bf16.msra.mxu1 %v5529_v47  ;;  %1595 = vmatprep.subr.bf16.mxu0 %v5534_v48  ;;  %v5611_v47 = vld [vmem:[#allocation2 + $0x66c] ss:$16 sps:$4 sm:$0xff]   ;;  %v5609_v48 = vld [vmem:[#allocation2 + $0x668] ss:$16 sps:$4 sm:$0xff]  }
  0xee   :  { %1743 = vmatprep.subr.bf16.mxu1 %v5537_v49  ;;  %1773 = vmatprep.mubr.bf16.mxu1 %v6330_v17  ;;  %v5625_v17 = vld [vmem:[#allocation4] sm:$0xff]   ;;  %v5614_v49 = vld [vmem:[#allocation2 + $0x68c] ss:$16 sps:$4 sm:$0xff]  }
  0xf0   :  { %1596 = vmatpush1.bf16.msra.mxu0 %v5532_v50  ;;  %v5612_v50 = vld [vmem:[#allocation2 + $0x688] ss:$16 sps:$4 sm:$0xff]  }
  0xf1   :  { %1744 = vmatpush1.bf16.msra.mxu1 %v5535_v51  ;;  %1597 = vmatprep.subr.bf16.mxu0 %v5540_v52  ;;  %v5617_v51 = vld [vmem:[#allocation2 + $0x6ac] ss:$16 sps:$4 sm:$0xff]   ;;  %v5615_v52 = vld [vmem:[#allocation2 + $0x6a8] ss:$16 sps:$4 sm:$0xff]  }
  0xf2   :  { %1745 = vmatprep.subr.bf16.mxu1 %v5543_v53  ;;  %v5620_v53 = vld [vmem:[#allocation2 + $0x6cc] ss:$16 sps:$4 sm:$0xff]  }
  0xf4   :  { %1598 = vmatpush1.bf16.msra.mxu0 %v5538_v54 }
  0xf5   :  { %1746 = vmatpush1.bf16.msra.mxu1 %v5541_v55  ;;  %1599 = vmatprep.subr.bf16.mxu0 %v5546_v56  ;;  %v5618_v55 = vld [vmem:[#allocation2 + $0x6c8] ss:$16 sps:$4 sm:$0xff]  }
  0xf6   :  { %1747 = vmatprep.subr.bf16.mxu1 %v5549_v57  ;;  %v5623_v57 = vld [vmem:[#allocation2 + $0x6ec] ss:$16 sps:$4 sm:$0xff]  }
  0xf8   :  { %1600 = vmatpush1.bf16.msra.mxu0 %v5544_v58 }
  0xf9   :  { %1748 = vmatpush1.bf16.msra.mxu1 %v5547_v59  ;;  %1601 = vmatprep.subr.bf16.mxu0 %v5552_v60  ;;  %v5621_v60 = vld [vmem:[#allocation2 + $0x6e8] ss:$16 sps:$4 sm:$0xff]  }
  0xfa   :  { %1749 = vmatprep.subr.bf16.mxu1 %v5555_v61  ;;  %v6068_v61 = vld [vmem:[%s6526_s0 + $0x18] ss:$0 sps:$4 sm:$0xff]  }
  0xfc   :  { %1602 = vmatpush1.bf16.msra.mxu0 %v5550_v62  ;;  %v5635_v62 = vld [vmem:[#allocation4 + $0x28] sm:$0xff]  }
  0xfd   :  { %1750 = vmatpush1.bf16.msra.mxu1 %v5553_v63  ;;  %1603 = vmatprep.subr.bf16.mxu0 %v5558_v1  ;;  %v5636_v63 = vld [vmem:[#allocation4 + $0x70] sm:$0xff]  }
  0xfe   :  { %1751 = vmatprep.subr.bf16.mxu1 %v5561_v2  ;;  %v5637_v1 = vld [vmem:[#allocation4 + $0x30] sm:$0xff]   ;;  %v5638_v2 = vld [vmem:[#allocation4 + $0x78] sm:$0xff]  }
 0x100   :  { %1604 = vmatpush1.bf16.msra.mxu0 %v5556_v3  ;;  %v5639_v3 = vld [vmem:[#allocation4 + $0x38] sm:$0xff]  }
 0x101   :  { %1752 = vmatpush1.bf16.msra.mxu1 %v5559_v4  ;;  %1605 = vmatprep.subr.bf16.mxu0 %v5564_v5  ;;  %v5640_v4 = vld [vmem:[#allocation4 + $0xc0] sm:$0xff]  }
 0x102   :  { %1753 = vmatprep.subr.bf16.mxu1 %v5567_v6  ;;  %v5641_v5 = vld [vmem:[#allocation4 + $0x80] sm:$0xff]   ;;  %v5642_v6 = vld [vmem:[#allocation4 + $0xc8] sm:$0xff]  }
 0x104   :  { %1606 = vmatpush1.bf16.msra.mxu0 %v5562_v7  ;;  %v5643_v7 = vld [vmem:[#allocation4 + $0x88] sm:$0xff]  }
 0x105   :  { %1754 = vmatpush1.bf16.msra.mxu1 %v5565_v8  ;;  %1607 = vmatprep.subr.bf16.mxu0 %v5570_v9  ;;  %v5644_v8 = vld [vmem:[#allocation4 + $0xd0] sm:$0xff]  }
 0x106   :  { %1755 = vmatprep.subr.bf16.mxu1 %v5573_v10  ;;  %v5645_v9 = vld [vmem:[#allocation4 + $0x90] sm:$0xff]   ;;  %v5646_v10 = vld [vmem:[#allocation4 + $0xd8] sm:$0xff]  }
 0x108   :  { %1608 = vmatpush1.bf16.msra.mxu0 %v5568_v11  ;;  %v5647_v11 = vld [vmem:[#allocation4 + $0x98] sm:$0xff]  }
 0x109   :  { %1756 = vmatpush1.bf16.msra.mxu1 %v5571_v12  ;;  %5078 = vmatprep.subr.bf16.mxu0 %v5624_v14  ;;  %v5648_v12 = vld [vmem:[#allocation4 + $0xe0] sm:$0xff]   ;;  %v5650_v14 = vld [vmem:[#allocation4 + $0xe8] sm:$0xff]  }
 0x10a   :  { %1757 = vmatprep.subr.bf16.mxu1 %v5578_v13  ;;  %v5649_v13 = vld [vmem:[#allocation4 + $0xa0] sm:$0xff]  }
 0x10b   :  { %1610 = vmatmul.mubr.bf16.vlgmr.msra.gmra.mrb[0].mxu0 %v4537_v18 }
 0x10c   :  { %5079 = vmatpush3.bf16.msra.mxu0 %v5625_v17  ;;  %v5652_v17 = vld [vmem:[#allocation4 + $0xf0] sm:$0xff]  }
 0x10d   :  { %1758 = vmatpush1.bf16.msra.mxu1 %v5576_v15  ;;  %5080 = vmatprep.subr.bf16.mxu0 %v5626_v20  ;;  %v5651_v15 = vld [vmem:[#allocation4 + $0xa8] sm:$0xff]   ;;  %v5655_v20 = vld [vmem:[#allocation4 + $0xb8] sm:$0xff]  }
 0x10e   :  { %1759 = vmatprep.subr.bf16.mxu1 %v5581_v19  ;;  %v5654_v19 = vld [vmem:[#allocation4 + $0xf8] sm:$0xff]  }
 0x110   :  { %5081 = vmatpush3.bf16.msra.mxu0 %v5627_v22 }
 0x111   :  { %1760 = vmatpush1.bf16.msra.mxu1 %v5579_v21  ;;  %5082 = vmatprep.subr.bf16.mxu0 %v5628_v24  ;;  %v330_v21 = vlaneseq  ;;  %v328_v24 = vld [vmem:[%s6528_s2] sm:$0xf] }
 0x112   :  { %1761 = vmatprep.subr.bf16.mxu1 %v5584_v23 }
 0x113   :  { %v6346_v22 = vshrl.u32 %v330_v21, 7  ;;  %v5670_v21 = vld [vmem:[%s6533_s7 + $0x30] sm:$0xff]  }
 0x114   :  { %5083 = vmatpush3.bf16.msra.mxu0 %v5629_v26 }
 0x115   :  { %1762 = vmatpush1.bf16.msra.mxu1 %v5582_v25  ;;  %5084 = vmatprep.subr.bf16.mxu0 %v5630_v28  ;;  %v6349_v23 = vsub.s32 0, %v6346_v22  ;;  %v6355_v25 = vsub.s32 1, %v6346_v22 }
 0x116   :  { %1763 = vmatprep.subr.bf16.mxu1 %v5587_v27 }
 0x117   :  { %v333_v26 = vrot.slane %v328_v24, %v6349_v23  ;;  %v337_v27 = vrot.slane %v328_v24, %v6355_v25 }
 0x118   :  { %5085 = vmatpush3.bf16.msra.mxu0 %v5631_v29 }
 0x119   :  { %1764 = vmatpush1.bf16.msra.mxu1 %v5585_v16  ;;  %5086 = vmatprep.subr.bf16.mxu0 %v5632_v31 }
 0x11a   :  { %1765 = vmatprep.subr.bf16.mxu1 %v5590_v30 }
 0x11c   :  { %5087 = vmatpush3.bf16.msra.mxu0 %v5633_v33 }
 0x11d   :  { %1766 = vmatpush1.bf16.msra.mxu1 %v5588_v32  ;;  %5088 = vmatprep.subr.bf16.mxu0 %v5634_v35 }
 0x11e   :  { %1767 = vmatprep.subr.bf16.mxu1 %v5593_v34 }
 0x120   :  { %5089 = vmatpush3.bf16.msra.mxu0 %v5635_v62  ;;  %v5664_v62 = vld [vmem:[%s6533_s7] sm:$0xff]  }
 0x121   :  { %1768 = vmatpush1.bf16.msra.mxu1 %v5591_v36  ;;  %5090 = vmatprep.subr.bf16.mxu0 %v5636_v63  ;;  %v5665_v63 = vld [vmem:[%s6533_s7 + $0x8] sm:$0xff]  }
 0x122   :  { %1769 = vmatprep.subr.bf16.mxu1 %v5596_v37 }
 0x124   :  { %5091 = vmatpush3.bf16.msra.mxu0 %v5637_v1  ;;  %v5666_v1 = vld [vmem:[%s6533_s7 + $0x10] sm:$0xff]  }
 0x125   :  { %1770 = vmatpush1.bf16.msra.mxu1 %v5594_v38  ;;  %5092 = vmatprep.subr.bf16.mxu0 %v5638_v2  ;;  %v5667_v2 = vld [vmem:[%s6533_s7 + $0x18] sm:$0xff]  }
 0x126   :  { %1771 = vmatprep.subr.bf16.mxu1 %v5599_v39  ;;  %v6362_v39 = vsub.s32 2, %v6346_v22 }
 0x128   :  { %5093 = vmatpush3.bf16.msra.mxu0 %v5639_v3  ;;  %v5668_v3 = vld [vmem:[%s6533_s7 + $0x20] sm:$0xff]  }
 0x129   :  { %1772 = vmatpush1.bf16.msra.mxu1 %v5597_v40  ;;  %v6365_v40 = vsub.s32 3, %v6346_v22 }
 0x12a   :  { %1782 = vmatprep.subr.bf16.mxu1 %v5602_v41  ;;  %v341_v41 = vrot.slane %v328_v24, %v6362_v39 }
 0x12c   :  { %1774 = vmatmul.mubr.bf16.vlgmr.msra.gmra.mrb[4].mxu1 %v4537_v18  ;;  %v5653_v18 = vld [vmem:[#allocation4 + $0xb0] sm:$0xff]  }
 0x12d   :  { %1783 = vmatpush1.bf16.msra.mxu1 %v5600_v42  ;;  %1814 = vmatprep.mubr.bf16.mxu1 %v6173_v0  ;;  %v345_v42 = vrot.slane %v328_v24, %v6365_v40  ;;  %v5671_v24 = vld [vmem:[%s6533_s7 + $0x38] sm:$0xff]  }
 0x12e   :  { %1784 = vmatprep.subr.bf16.mxu1 %v5605_v43 }
 0x131   :  { %1785 = vmatpush1.bf16.msra.mxu1 %v5603_v44 }
 0x132   :  { %1786 = vmatprep.subr.bf16.mxu1 %v5608_v45 }
 0x135   :  { %1787 = vmatpush1.bf16.msra.mxu1 %v5606_v46 }
 0x136   :  { %1788 = vmatprep.subr.bf16.mxu1 %v5611_v47 }
 0x139   :  { %1789 = vmatpush1.bf16.msra.mxu1 %v5609_v48 }
 0x13a   :  { %1790 = vmatprep.subr.bf16.mxu1 %v5614_v49 }
 0x13d   :  { %1791 = vmatpush1.bf16.msra.mxu1 %v5612_v50 }
 0x13e   :  { %1792 = vmatprep.subr.bf16.mxu1 %v5617_v51 }
 0x13f   :  { %v6339_v54 = vpop.f32.mrb[0].mxu1 }
 0x140   :  { %v6341_v56 = vpop.f32.mrb[1].mxu1 }
 0x141   :  { %v1656_v58 = vpop.f32.mrb[2].mxu1  ;;  %1793 = vmatpush1.bf16.msra.mxu1 %v5615_v52 }
 0x142   :  { %v1657_v59 = vpop.f32.mrb[3].mxu1  ;;  %1794 = vmatprep.subr.bf16.mxu1 %v5620_v53  ;;  %v5656_v53 = vld [vmem:[%s6531_s5] sm:$0xff]  }
 0x143   :  { %v5660_v58 = vld [vmem:[%s6531_s5 + $0x20] sm:$0xff]   ;;  %v5661_v59 = vld [vmem:[%s6531_s5 + $0x28] sm:$0xff]  }
 0x145   :  { %1795 = vmatpush1.bf16.msra.mxu1 %v5618_v55  ;;  %v5657_v55 = vld [vmem:[%s6531_s5 + $0x8] sm:$0xff]  }
 0x146   :  { %1796 = vmatprep.subr.bf16.mxu1 %v5623_v57  ;;  %v5659_v57 = vld [vmem:[%s6531_s5 + $0x18] sm:$0xff]  }
 0x149   :  { %1797 = vmatpush1.bf16.msra.mxu1 %v5621_v60  ;;  %v5662_v60 = vld [vmem:[%s6531_s5 + $0x30] sm:$0xff]  }
 0x14a   :  { %5100 = vmatprep.subr.bf16.mxu1 %v5640_v4  ;;  %v5669_v4 = vld [vmem:[%s6533_s7 + $0x28] sm:$0xff]  }
 0x14c   :  { %1815 = vmatmul.mubr.bf16.vlgmr.msra.gmra.mrb[4].mxu1 %v6068_v61  ;;  %v5663_v61 = vld [vmem:[%s6531_s5 + $0x38] sm:$0xff]  }
 0x14d   :  { %5101 = vmatpush3.bf16.msra.mxu1 %v5641_v5 }
 0x14e   :  { %5102 = vmatprep.subr.bf16.mxu1 %v5642_v6 }
 0x151   :  { %5103 = vmatpush3.bf16.msra.mxu1 %v5643_v7 }
 0x152   :  { %5104 = vmatprep.subr.bf16.mxu1 %v5644_v8 }
 0x155   :  { %5105 = vmatpush3.bf16.msra.mxu1 %v5645_v9 }
 0x156   :  { %5106 = vmatprep.subr.bf16.mxu1 %v5646_v10  ;;  %v4764_v10 = vld [vmem:[%s6530_s4] ss:$0 sm:$0xff] }
 0x159   :  { %5107 = vmatpush3.bf16.msra.mxu1 %v5647_v11 }
 0x15a   :  { %5108 = vmatprep.subr.bf16.mxu1 %v5648_v12 }
 0x15d   :  { %5109 = vmatpush3.bf16.msra.mxu1 %v5649_v13 }
 0x15e   :  { %5110 = vmatprep.subr.bf16.mxu1 %v5650_v14 }
 0x161   :  { %5111 = vmatpush3.bf16.msra.mxu1 %v5651_v15 }
 0x162   :  { %5112 = vmatprep.subr.bf16.mxu1 %v5652_v17 }
 0x165   :  { %5113 = vmatpush3.bf16.msra.mxu1 %v5653_v18 }
 0x166   :  { %5114 = vmatprep.subr.bf16.mxu1 %v5654_v19 }
 0x169   :  { %5115 = vmatpush3.bf16.msra.mxu1 %v5655_v20 }
 0x1de   :  { %v1611_v28 = vpop.f32.mrb[0].mxu0 }
 0x1df   :  { %v5224_v16 = vadd.f32 %v1611_v28, %v333_v26  ;;  %v1613_v29 = vpop.f32.mrb[1].mxu0  ;;  %v5672_v26 = vld [vmem:[#allocation6] ss:$16 sps:$4 sm:$0xff]   ;;  %v5677_v28 = vld [vmem:[#allocation6 + $0xc] ss:$16 sps:$4 sm:$0xff]  }
 0x1e0   :  { %v5226_v30 = vadd.f32 %v1613_v29, %v337_v27  ;;  %v1615_v31 = vpop.f32.mrb[2].mxu0  ;;  %v5674_v27 = vld [vmem:[#allocation6 + $0x4] ss:$16 sps:$4 sm:$0xff]   ;;  %v5678_v29 = vld [vmem:[#allocation6 + $0x20] ss:$16 sps:$4 sm:$0xff]  }
 0x1e1   :  { %v5225_v32 = vadd.f32 %v5224_v16, %v6339_v54  ;;  %v1616_v33 = vpop.f32.mrb[3].mxu0  ;;  %v6174_v54 = vmov 0.0   ;;  %v5680_v16 = vld [vmem:[#allocation6 + $0x24] ss:$16 sps:$4 sm:$0xff]   ;;  %v5684_v31 = vld [vmem:[#allocation6 + $0x40] ss:$16 sps:$4 sm:$0xff]  }
 0x1e2   :  { %v5227_v34 = vadd.f32 %v5226_v30, %v6341_v56  ;;  %5184 = vmatprep.subr.bf16.mxu0 %v6174_v54  ;;  %5204 = vmatprep.subr.bf16.mxu1 %v6174_v54  ;;  %v5658_v56 = vld [vmem:[%s6531_s5 + $0x10] sm:$0xff]  }
 0x1e3   :  { %v1823_v35 = vmax.f32 %v5225_v32, 0.0  ;;  %v5686_v30 = vld [vmem:[#allocation6 + $0x44] ss:$16 sps:$4 sm:$0xff]   ;;  %v5690_v33 = vld [vmem:[#allocation6 + $0x60] ss:$16 sps:$4 sm:$0xff]  }
 0x1e4   :  { %v1824_v36 = vmax.f32 %v5227_v34, 0.0  ;;  %v5692_v32 = vld [vmem:[#allocation6 + $0x64] ss:$16 sps:$4 sm:$0xff]  }
 0x1e5   :  { %v1827_v38 = vpack.c.bf16 %v1823_v35, %v1823_v35  ;;  %v5698_v34 = vld [vmem:[#allocation6 + $0x84] ss:$16 sps:$4 sm:$0xff]   ;;  %v5696_v35 = vld [vmem:[#allocation6 + $0x80] ss:$16 sps:$4 sm:$0xff]  }
 0x1e6   :  { %v1828_v37 = vpack.c.bf16 %v1824_v36, %v1824_v36  ;;  %v5704_v36 = vld [vmem:[#allocation6 + $0xa4] ss:$16 sps:$4 sm:$0xff]  }
 0x1e8   :  { %2126 = vmatprep.mubr.bf16.mxu0 %v1828_v37  ;;  %v5702_v37 = vld [vmem:[#allocation6 + $0xa0] ss:$16 sps:$4 sm:$0xff]  }
 0x1e9   :  { %2127 = vmatmul.mubr.bf16.vlgmr.msra.gmra.mrb[4].mxu0 %v1827_v38  ;;  %v5710_v38 = vld [vmem:[#allocation6 + $0xc4] ss:$16 sps:$4 sm:$0xff]  }
 0x1ea   :  { %5185 = vmatpush3.bf16.msra.mxu0 %v5656_v53  ;;  %5200 = vmatprep.mubr.msk.bf16.mxu0 %vm6175_vm0, %v6174_v54  ;;  %v5689_v53 = vld [vmem:[#allocation6 + $0x4c] ss:$16 sps:$4 sm:$0xff]  }
 0x1eb   :  { %5186 = vmatprep.subr.bf16.mxu0 %v6174_v54 }
 0x1ee   :  { %5187 = vmatpush3.bf16.msra.mxu0 %v5657_v55  ;;  %v5695_v55 = vld [vmem:[#allocation6 + $0x6c] ss:$16 sps:$4 sm:$0xff]  }
 0x1ef   :  { %5188 = vmatprep.subr.bf16.mxu0 %v6174_v54 }
 0x1f2   :  { %5189 = vmatpush3.bf16.msra.mxu0 %v5658_v56  ;;  %v5693_v56 = vld [vmem:[#allocation6 + $0x68] ss:$16 sps:$4 sm:$0xff]  }
 0x1f3   :  { %5190 = vmatprep.subr.bf16.mxu0 %v6174_v54 }
 0x1f6   :  { %5191 = vmatpush3.bf16.msra.mxu0 %v5659_v57  ;;  %v5701_v57 = vld [vmem:[#allocation6 + $0x8c] ss:$16 sps:$4 sm:$0xff]  }
 0x1f7   :  { %5192 = vmatprep.subr.bf16.mxu0 %v6174_v54 }
 0x1fa   :  { %5193 = vmatpush3.bf16.msra.mxu0 %v5660_v58  ;;  %v5699_v58 = vld [vmem:[#allocation6 + $0x88] ss:$16 sps:$4 sm:$0xff]  }
 0x1fb   :  { %5194 = vmatprep.subr.bf16.mxu0 %v6174_v54 }
 0x1fe   :  { %5195 = vmatpush3.bf16.msra.mxu0 %v5661_v59  ;;  %v5707_v59 = vld [vmem:[#allocation6 + $0xac] ss:$16 sps:$4 sm:$0xff]  }
 0x1ff   :  { %5196 = vmatprep.subr.bf16.mxu0 %v6174_v54 }
 0x202   :  { %5197 = vmatpush3.bf16.msra.mxu0 %v5662_v60  ;;  %v5705_v60 = vld [vmem:[#allocation6 + $0xa8] ss:$16 sps:$4 sm:$0xff]  }
 0x203   :  { %5198 = vmatprep.subr.bf16.mxu0 %v6174_v54 }
 0x206   :  { %5199 = vmatpush3.bf16.msra.mxu0 %v5663_v61  ;;  %v5713_v61 = vld [vmem:[#allocation6 + $0xcc] ss:$16 sps:$4 sm:$0xff]  }
 0x207   :  { %2616 = vmatprep.subr.bf16.mxu0 %v5674_v27  ;;  %v5740_v27 = vld [vmem:[#allocation7 + $0xac] ss:$28 sps:$4 sm:$0xff]  }
 0x21f   :  { %v1816_v43 = vpop.f32.mrb[4].mxu1 }
 0x220   :  { %v5228_v44 = vadd.f32 %v1816_v43, %v341_v41  ;;  %v1818_v45 = vpop.f32.mrb[5].mxu1  ;;  %v5708_v41 = vld [vmem:[#allocation6 + $0xc0] ss:$16 sps:$4 sm:$0xff]  }
 0x221   :  { %v5229_v46 = vadd.f32 %v1818_v45, %v345_v42  ;;  %v1820_v47 = vpop.f32.mrb[6].mxu1  ;;  %v4797_v42 = vld [vmem:[%s6532_s6] ss:$0 sm:$0xff] }
 0x222   :  { %v1825_v48 = vmax.f32 %v5228_v44, 0.0  ;;  %v1821_v49 = vpop.f32.mrb[7].mxu1 }
 0x223   :  { %v1826_v50 = vmax.f32 %v5229_v46, 0.0  ;;  %v5675_v49 = vld [vmem:[#allocation6 + $0x8] ss:$16 sps:$4 sm:$0xff]  }
 0x224   :  { %v1829_v52 = vpack.c.bf16 %v1825_v48, %v1825_v48 }
 0x225   :  { %v1830_v51 = vpack.c.bf16 %v1826_v50, %v1826_v50 }
 0x227   :  { %2166 = vmatprep.mubr.bf16.mxu1 %v1830_v51  ;;  %v5683_v51 = vld [vmem:[#allocation6 + $0x2c] ss:$16 sps:$4 sm:$0xff]  }
 0x228   :  { %2167 = vmatmul.mubr.bf16.vlgmr.msra.gmra.mrb[8].mxu1 %v1829_v52  ;;  %v5681_v52 = vld [vmem:[#allocation6 + $0x28] ss:$16 sps:$4 sm:$0xff]  }
 0x229   :  { %5220 = vmatprep.mubr.msk.bf16.mxu1 %vm6175_vm0, %v6174_v54  ;;  %5205 = vmatpush3.bf16.msra.mxu1 %v5664_v62  ;;  %v5716_v62 = vld [vmem:[#allocation6 + $0xe4] ss:$16 sps:$4 sm:$0xff]  }
 0x22a   :  { %5206 = vmatprep.subr.bf16.mxu1 %v6174_v54 }
 0x22d   :  { %5207 = vmatpush3.bf16.msra.mxu1 %v5665_v63  ;;  %v5719_v63 = vld [vmem:[#allocation6 + $0xec] ss:$16 sps:$4 sm:$0xff]  }
 0x22e   :  { %5208 = vmatprep.subr.bf16.mxu1 %v6174_v54 }
 0x231   :  { %5209 = vmatpush3.bf16.msra.mxu1 %v5666_v1  ;;  %v5714_v1 = vld [vmem:[#allocation6 + $0xe0] ss:$16 sps:$4 sm:$0xff]  }
 0x232   :  { %5210 = vmatprep.subr.bf16.mxu1 %v6174_v54 }
 0x235   :  { %5211 = vmatpush3.bf16.msra.mxu1 %v5667_v2  ;;  %v5717_v2 = vld [vmem:[#allocation6 + $0xe8] ss:$16 sps:$4 sm:$0xff]  }
 0x236   :  { %5212 = vmatprep.subr.bf16.mxu1 %v6174_v54 }
 0x239   :  { %5213 = vmatpush3.bf16.msra.mxu1 %v5668_v3  ;;  %v5722_v3 = vld [vmem:[#allocation7 + $0x4] ss:$28 sps:$4 sm:$0xff]  }
 0x23a   :  { %5214 = vmatprep.subr.bf16.mxu1 %v6174_v54 }
 0x23d   :  { %5215 = vmatpush3.bf16.msra.mxu1 %v5669_v4  ;;  %v5725_v4 = vld [vmem:[#allocation7 + $0xc] ss:$28 sps:$4 sm:$0xff]  }
 0x23e   :  { %5216 = vmatprep.subr.bf16.mxu1 %v6174_v54 }
 0x241   :  { %5217 = vmatpush3.bf16.msra.mxu1 %v5670_v21  ;;  %v5737_v21 = vld [vmem:[#allocation7 + $0x7c] ss:$28 sps:$4 sm:$0xff]  }
 0x242   :  { %5218 = vmatprep.subr.bf16.mxu1 %v6174_v54  ;;  %v5687_v54 = vld [vmem:[#allocation6 + $0x48] ss:$16 sps:$4 sm:$0xff]  }
 0x245   :  { %5219 = vmatpush3.bf16.msra.mxu1 %v5671_v24  ;;  %v5732_v24 = vld [vmem:[#allocation7 + $0x70] ss:$28 sps:$4 sm:$0xff]  }
 0x246   :  { %2657 = vmatprep.subr.bf16.mxu1 %v5677_v28  ;;  %v5743_v28 = vld [vmem:[#allocation7 + $0xb4] ss:$28 sps:$4 sm:$0xff]  }
 0x2bc   :  { %v5094_v5 = vpop.f32.mrb[4].mxu0 }
 0x2bd   :  { %v5095_v6 = vpop.f32.mrb[5].mxu0 }
 0x2be   :  { %v5096_v7 = vadd.f32 %v5095_v6, %v5094_v5  ;;  %v5097_v8 = vpop.f32.mrb[6].mxu0  ;;  %v4806_v5 = vld [vmem:[%s6534_s8] ss:$0 sm:$0xff] }
 0x2bf   :  { %v5098_v9 = vpop.f32.mrb[7].mxu0 }
 0x2c0   :  { %v2129_v13 = vadd.f32 %v5096_v7, %v4764_v10 }
 0x2fb   :  { %v5116_v11 = vpop.f32.mrb[8].mxu1 }
 0x2fc   :  { %v5117_v12 = vpop.f32.mrb[9].mxu1 }
 0x2fd   :  { %v5118_v14 = vadd.f32 %v5117_v12, %v5116_v11  ;;  %v5119_v15 = vpop.f32.mrb[10].mxu1  ;;  %v5720_v12 = vld [vmem:[#allocation7] ss:$28 sps:$4 sm:$0xff]  }
 0x2fe   :  { %v5120_v17 = vpop.f32.mrb[11].mxu1  ;;  %v5728_v15 = vld [vmem:[#allocation7 + $0x3c] ss:$28 sps:$4 sm:$0xff]  }
 0x2ff   :  { %v2169_v18 = vadd.f32 %v5118_v14, %v2129_v13  ;;  %v5723_v13 = vld [vmem:[#allocation7 + $0x8] ss:$28 sps:$4 sm:$0xff]  }
 0x300   :  { %v5731_v17 = vld [vmem:[#allocation7 + $0x44] ss:$28 sps:$4 sm:$0xff]  }
 0x301   :  { %v2174_v19 = vmax.f32 %v2169_v18, 0.0  ;;  %v5726_v18 = vld [vmem:[#allocation7 + $0x38] ss:$28 sps:$4 sm:$0xff]  }
 0x303   :  { %v2175_v20 = vpack.c.bf16 %v2174_v19, %v2174_v19  ;;  %v5729_v19 = vld [vmem:[#allocation7 + $0x40] ss:$28 sps:$4 sm:$0xff]  }
 0x305   :  { %5201 = vmatmul.mubr.bf16.vlgmr.msra.gmra.mrb[8].mxu0 %v2175_v20  ;;  %v5734_v20 = vld [vmem:[#allocation7 + $0x74] ss:$28 sps:$4 sm:$0xff]  }
 0x306   :  { %2648 = vmatprep.mubr.bf16.mxu0 %v6173_v0  ;;  %2617 = vmatpush1.bf16.msra.mxu0 %v5672_v26  ;;  %v5735_v26 = vld [vmem:[#allocation7 + $0x78] ss:$28 sps:$4 sm:$0xff]  }
 0x307   :  { %2618 = vmatprep.subr.bf16.mxu0 %v5680_v16  ;;  %v5738_v16 = vld [vmem:[#allocation7 + $0xa8] ss:$28 sps:$4 sm:$0xff]  }
 0x30a   :  { %2619 = vmatpush1.bf16.msra.mxu0 %v5678_v29  ;;  %v5741_v29 = vld [vmem:[#allocation7 + $0xb0] ss:$28 sps:$4 sm:$0xff]  }
 0x30b   :  { %2620 = vmatprep.subr.bf16.mxu0 %v5686_v30  ;;  %v5746_v30 = vld [vmem:[#allocation7 + $0xe4] ss:$28 sps:$4 sm:$0xff]  }
 0x30e   :  { %2621 = vmatpush1.bf16.msra.mxu0 %v5684_v31  ;;  %v5749_v31 = vld [vmem:[#allocation7 + $0xec] ss:$28 sps:$4 sm:$0xff]  }
 0x30f   :  { %2622 = vmatprep.subr.bf16.mxu0 %v5692_v32  ;;  %v5744_v32 = vld [vmem:[#allocation7 + $0xe0] ss:$28 sps:$4 sm:$0xff]  }
 0x312   :  { %2623 = vmatpush1.bf16.msra.mxu0 %v5690_v33  ;;  %v5747_v33 = vld [vmem:[#allocation7 + $0xe8] ss:$28 sps:$4 sm:$0xff]  }
 0x313   :  { %2624 = vmatprep.subr.bf16.mxu0 %v5698_v34  ;;  %v5752_v34 = vld [vmem:[#allocation7 + $0x11c] ss:$28 sps:$4 sm:$0xff]  }
 0x316   :  { %2625 = vmatpush1.bf16.msra.mxu0 %v5696_v35  ;;  %v5755_v35 = vld [vmem:[#allocation7 + $0x124] ss:$28 sps:$4 sm:$0xff]  }
 0x317   :  { %2626 = vmatprep.subr.bf16.mxu0 %v5704_v36  ;;  %v5750_v36 = vld [vmem:[#allocation7 + $0x118] ss:$28 sps:$4 sm:$0xff]  }
 0x31a   :  { %2627 = vmatpush1.bf16.msra.mxu0 %v5702_v37  ;;  %v5753_v37 = vld [vmem:[#allocation7 + $0x120] ss:$28 sps:$4 sm:$0xff]  }
 0x31b   :  { %2628 = vmatprep.subr.bf16.mxu0 %v5710_v38  ;;  %v5758_v38 = vld [vmem:[#allocation7 + $0x154] ss:$28 sps:$4 sm:$0xff]  }
 0x31e   :  { %2629 = vmatpush1.bf16.msra.mxu0 %v5708_v41  ;;  %v5761_v41 = vld [vmem:[#allocation7 + $0x15c] ss:$28 sps:$4 sm:$0xff]  }
 0x31f   :  { %2630 = vmatprep.subr.bf16.mxu0 %v5716_v62  ;;  %v5789_v62 = vld [vmem:[#allocation7 + $0x270] ss:$28 sps:$4 sm:$0xff]  }
 0x322   :  { %2631 = vmatpush1.bf16.msra.mxu0 %v5714_v1  ;;  %v5797_v1 = vld [vmem:[#allocation7 + $0x2ac] ss:$28 sps:$4 sm:$0xff]  }
 0x323   :  { %4151 = vmatprep.subr.bf16.mxu0 %v5722_v3  ;;  %v5795_v3 = vld [vmem:[#allocation7 + $0x2a8] ss:$28 sps:$4 sm:$0xff]  }
 0x3d8   :  { %v2281_v43 = vpop.f32.mrb[8].mxu0 }
 0x3d9   :  { %v2282_v44 = vadd.f32 %v4797_v42, %v2281_v43  ;;  %v5202_v45 = vpop.f32.mrb[9].mxu0  ;;  %v5756_v42 = vld [vmem:[#allocation7 + $0x150] ss:$28 sps:$4 sm:$0xff]   ;;  %v5759_v43 = vld [vmem:[#allocation7 + $0x158] ss:$28 sps:$4 sm:$0xff]  }
 0x3da   :  { %v2284_v46 = vpop.f32.mrb[10].mxu0  ;;  %v5767_v45 = vld [vmem:[#allocation7 + $0x194] ss:$28 sps:$4 sm:$0xff]  }
 0x3db   :  { %v2287_v47 = vmax.f32 %v2282_v44, 0.0  ;;  %v5203_v48 = vpop.f32.mrb[11].mxu0  ;;  %v5764_v44 = vld [vmem:[#allocation7 + $0x18c] ss:$28 sps:$4 sm:$0xff]  }
 0x3dc   :  { %v5762_v46 = vld [vmem:[#allocation7 + $0x188] ss:$28 sps:$4 sm:$0xff]  }
 0x3dd   :  { %v2288_v50 = vpack.c.bf16 %v2287_v47, %v2287_v47  ;;  %v5765_v47 = vld [vmem:[#allocation7 + $0x190] ss:$28 sps:$4 sm:$0xff]   ;;  %v5770_v48 = vld [vmem:[#allocation7 + $0x1c4] ss:$28 sps:$4 sm:$0xff]  }
 0x3df   :  { %5221 = vmatmul.mubr.bf16.vlgmr.msra.gmra.mrb[12].mxu1 %v2288_v50  ;;  %v5768_v50 = vld [vmem:[#allocation7 + $0x1c0] ss:$28 sps:$4 sm:$0xff]  }
 0x3e0   :  { %2658 = vmatpush1.bf16.msra.mxu1 %v5675_v49  ;;  %2689 = vmatprep.mubr.bf16.mxu1 %v6173_v0  ;;  %v5711_v0 = vld [vmem:[#allocation6 + $0xc8] ss:$16 sps:$4 sm:$0xff]  }
 0x3e1   :  { %2659 = vmatprep.subr.bf16.mxu1 %v5683_v51  ;;  %v5773_v49 = vld [vmem:[#allocation7 + $0x1cc] ss:$28 sps:$4 sm:$0xff]  }
 0x3e2   :  { %v5771_v51 = vld [vmem:[#allocation7 + $0x1c8] ss:$28 sps:$4 sm:$0xff]  }
 0x3e4   :  { %2660 = vmatpush1.bf16.msra.mxu1 %v5681_v52  ;;  %v5776_v52 = vld [vmem:[#allocation7 + $0x1fc] ss:$28 sps:$4 sm:$0xff]  }
 0x3e5   :  { %2661 = vmatprep.subr.bf16.mxu1 %v5689_v53  ;;  %v5779_v53 = vld [vmem:[#allocation7 + $0x204] ss:$28 sps:$4 sm:$0xff]  }
 0x3e8   :  { %2662 = vmatpush1.bf16.msra.mxu1 %v5687_v54  ;;  %v5774_v54 = vld [vmem:[#allocation7 + $0x1f8] ss:$28 sps:$4 sm:$0xff]  }
 0x3e9   :  { %2663 = vmatprep.subr.bf16.mxu1 %v5695_v55  ;;  %v5777_v55 = vld [vmem:[#allocation7 + $0x200] ss:$28 sps:$4 sm:$0xff]  }
 0x3ec   :  { %2664 = vmatpush1.bf16.msra.mxu1 %v5693_v56  ;;  %v5782_v56 = vld [vmem:[#allocation7 + $0x234] ss:$28 sps:$4 sm:$0xff]  }
 0x3ed   :  { %2665 = vmatprep.subr.bf16.mxu1 %v5701_v57  ;;  %v5785_v57 = vld [vmem:[#allocation7 + $0x23c] ss:$28 sps:$4 sm:$0xff]  }
 0x3f0   :  { %2666 = vmatpush1.bf16.msra.mxu1 %v5699_v58  ;;  %v5780_v58 = vld [vmem:[#allocation7 + $0x230] ss:$28 sps:$4 sm:$0xff]  }
 0x3f1   :  { %2667 = vmatprep.subr.bf16.mxu1 %v5707_v59  ;;  %v5783_v59 = vld [vmem:[#allocation7 + $0x238] ss:$28 sps:$4 sm:$0xff]  }
 0x3f4   :  { %2668 = vmatpush1.bf16.msra.mxu1 %v5705_v60  ;;  %v5788_v60 = vld [vmem:[#allocation7 + $0x26c] ss:$28 sps:$4 sm:$0xff]  }
 0x3f5   :  { %2669 = vmatprep.subr.bf16.mxu1 %v5713_v61  ;;  %v5791_v61 = vld [vmem:[#allocation7 + $0x274] ss:$28 sps:$4 sm:$0xff]  }
 0x3f8   :  { %2670 = vmatpush1.bf16.msra.mxu1 %v5711_v0  ;;  %v5786_v0 = vld [vmem:[#allocation7 + $0x268] ss:$28 sps:$4 sm:$0xff]  }
 0x3f9   :  { %2671 = vmatprep.subr.bf16.mxu1 %v5719_v63  ;;  %v5794_v63 = vld [vmem:[#allocation7 + $0x2a4] ss:$28 sps:$4 sm:$0xff]  }
 0x3fc   :  { %2672 = vmatpush1.bf16.msra.mxu1 %v5717_v2  ;;  %v5792_v2 = vld [vmem:[#allocation7 + $0x2a0] ss:$28 sps:$4 sm:$0xff]  }
 0x3fd   :  { %4233 = vmatprep.subr.bf16.mxu1 %v5725_v4  ;;  %v5800_v4 = vld [vmem:[#allocation7 + $0x2dc] ss:$28 sps:$4 sm:$0xff]  }
 0x4b2   :  { %v2394_v6 = vpop.f32.mrb[12].mxu1 }
 0x4b3   :  { %v2395_v7 = vadd.f32 %v4806_v5, %v2394_v6  ;;  %v5222_v8 = vpop.f32.mrb[13].mxu1  ;;  %v5803_v5 = vld [vmem:[#allocation7 + $0x2e4] ss:$28 sps:$4 sm:$0xff]   ;;  %v5798_v6 = vld [vmem:[#allocation7 + $0x2d8] ss:$28 sps:$4 sm:$0xff]  }
 0x4b4   :  { %v2397_v9 = vpop.f32.mrb[14].mxu1  ;;  %v5806_v8 = vld [vmem:[#allocation7 + $0x314] ss:$28 sps:$4 sm:$0xff]  }
 0x4b5   :  { %v2400_v10 = vmax.f32 %v2395_v7, 0.0  ;;  %v5223_v11 = vpop.f32.mrb[15].mxu1  ;;  %v5801_v7 = vld [vmem:[#allocation7 + $0x2e0] ss:$28 sps:$4 sm:$0xff]  }
 0x4b6   :  { %v5809_v9 = vld [vmem:[#allocation7 + $0x31c] ss:$28 sps:$4 sm:$0xff]  }
 0x4b7   :  { %v2401_v14 = vpack.c.bf16 %v2400_v10, %v2400_v10  ;;  %v5804_v10 = vld [vmem:[#allocation7 + $0x310] ss:$28 sps:$4 sm:$0xff]   ;;  %v5807_v11 = vld [vmem:[#allocation7 + $0x318] ss:$28 sps:$4 sm:$0xff]  }
 0x4b9   :  { %2649 = vmatmul.mubr.bf16.vlgmr.msra.gmra.mrb[12].mxu0 %v2401_v14  ;;  %2690 = vmatmul.mubr.bf16.vlgmr.msra.gmra.mrb[16].mxu1 %v2401_v14  ;;  %v5810_v14 = vld [vmem:[#allocation7 + $0x348] ss:$28 sps:$4 sm:$0xff]  }
 0x4ba   :  { %4152 = vmatpush1.bf16.msra.mxu0 %v5720_v12  ;;  %4234 = vmatpush1.bf16.msra.mxu1 %v5723_v13  ;;  %v5812_v12 = vld [vmem:[#allocation7 + $0x34c] ss:$28 sps:$4 sm:$0xff]   ;;  %v5815_v13 = vld [vmem:[#allocation7 + $0x354] ss:$28 sps:$4 sm:$0xff]  }
 0x4bb   :  { %4153 = vmatprep.subr.bf16.mxu0 %v5728_v15  ;;  %4235 = vmatprep.subr.bf16.mxu1 %v5731_v17  ;;  %v5813_v15 = vld [vmem:[#allocation7 + $0x350] ss:$28 sps:$4 sm:$0xff]   ;;  %v5818_v17 = vld [vmem:[#allocation7 + $0x384] ss:$28 sps:$4 sm:$0xff]  }
 0x4be   :  { %4154 = vmatpush1.bf16.msra.mxu0 %v5726_v18  ;;  %4236 = vmatpush1.bf16.msra.mxu1 %v5729_v19  ;;  %v5821_v18 = vld [vmem:[#allocation7 + $0x38c] ss:$28 sps:$4 sm:$0xff]   ;;  %v6449_v19 = vld [vmem:[%s6536_s10] sm:$0xf] }
 0x4bf   :  { %4155 = vmatprep.subr.bf16.mxu0 %v5734_v20  ;;  %4237 = vmatprep.subr.bf16.mxu1 %v5737_v21  ;;  %v2439_v20 = vrot.slane %v6449_v19, %v6349_v23  ;;  %v2443_v21 = vrot.slane %v6449_v19, %v6355_v25 }
 0x4c2   :  { %4156 = vmatpush1.bf16.msra.mxu0 %v5732_v24  ;;  %4238 = vmatpush1.bf16.msra.mxu1 %v5735_v26  ;;  %v2451_v24 = vrot.slane %v6449_v19, %v6365_v40 }
 0x4c3   :  { %4157 = vmatprep.subr.bf16.mxu0 %v5740_v27  ;;  %4239 = vmatprep.subr.bf16.mxu1 %v5743_v28 }
 0x4c6   :  { %4158 = vmatpush1.bf16.msra.mxu0 %v5738_v16  ;;  %4240 = vmatpush1.bf16.msra.mxu1 %v5741_v29 }
 0x4c7   :  { %4159 = vmatprep.subr.bf16.mxu0 %v5746_v30  ;;  %4241 = vmatprep.subr.bf16.mxu1 %v5749_v31 }
 0x4ca   :  { %4160 = vmatpush1.bf16.msra.mxu0 %v5744_v32  ;;  %4242 = vmatpush1.bf16.msra.mxu1 %v5747_v33 }
 0x4cb   :  { %4161 = vmatprep.subr.bf16.mxu0 %v5752_v34  ;;  %4243 = vmatprep.subr.bf16.mxu1 %v5755_v35 }
 0x4ce   :  { %4162 = vmatpush1.bf16.msra.mxu0 %v5750_v36  ;;  %4244 = vmatpush1.bf16.msra.mxu1 %v5753_v37 }
 0x4cf   :  { %4163 = vmatprep.subr.bf16.mxu0 %v5758_v38  ;;  %4245 = vmatprep.subr.bf16.mxu1 %v5761_v41 }
 0x4d2   :  { %4164 = vmatpush1.bf16.msra.mxu0 %v5756_v42  ;;  %4246 = vmatpush1.bf16.msra.mxu1 %v5759_v43  ;;  %v5816_v42 = vld [vmem:[#allocation7 + $0x380] ss:$28 sps:$4 sm:$0xff]   ;;  %v5819_v43 = vld [vmem:[#allocation7 + $0x388] ss:$28 sps:$4 sm:$0xff]  }
 0x4d3   :  { %4165 = vmatprep.subr.bf16.mxu0 %v5764_v44  ;;  %4247 = vmatprep.subr.bf16.mxu1 %v5767_v45  ;;  %v5824_v45 = vld [vmem:[#allocation7 + $0x3bc] ss:$28 sps:$4 sm:$0xff]  }
 0x4d6   :  { %4166 = vmatpush1.bf16.msra.mxu0 %v5762_v46  ;;  %4248 = vmatpush1.bf16.msra.mxu1 %v5765_v47  ;;  %v5827_v46 = vld [vmem:[#allocation7 + $0x3c4] ss:$28 sps:$4 sm:$0xff]  }
 0x4d7   :  { %4167 = vmatprep.subr.bf16.mxu0 %v5770_v48  ;;  %4249 = vmatprep.subr.bf16.mxu1 %v5773_v49  ;;  %v5822_v48 = vld [vmem:[#allocation7 + $0x3b8] ss:$28 sps:$4 sm:$0xff]   ;;  %v5825_v49 = vld [vmem:[#allocation7 + $0x3c0] ss:$28 sps:$4 sm:$0xff]  }
 0x4da   :  { %4168 = vmatpush1.bf16.msra.mxu0 %v5768_v50  ;;  %4250 = vmatpush1.bf16.msra.mxu1 %v5771_v51  ;;  %v5830_v50 = vld [vmem:[#allocation7 + $0x3f4] ss:$28 sps:$4 sm:$0xff]   ;;  %v5833_v51 = vld [vmem:[#allocation7 + $0x3fc] ss:$28 sps:$4 sm:$0xff]  }
 0x4db   :  { %4169 = vmatprep.subr.bf16.mxu0 %v5776_v52  ;;  %4251 = vmatprep.subr.bf16.mxu1 %v5779_v53  ;;  %v5828_v52 = vld [vmem:[#allocation7 + $0x3f0] ss:$28 sps:$4 sm:$0xff]   ;;  %v5831_v53 = vld [vmem:[#allocation7 + $0x3f8] ss:$28 sps:$4 sm:$0xff]  }
 0x4de   :  { %4170 = vmatpush1.bf16.msra.mxu0 %v5774_v54  ;;  %4252 = vmatpush1.bf16.msra.mxu1 %v5777_v55  ;;  %v5836_v54 = vld [vmem:[#allocation7 + $0x42c] ss:$28 sps:$4 sm:$0xff]   ;;  %v5839_v55 = vld [vmem:[#allocation7 + $0x434] ss:$28 sps:$4 sm:$0xff]  }
 0x4df   :  { %4171 = vmatprep.subr.bf16.mxu0 %v5782_v56  ;;  %4253 = vmatprep.subr.bf16.mxu1 %v5785_v57  ;;  %v5834_v56 = vld [vmem:[#allocation7 + $0x428] ss:$28 sps:$4 sm:$0xff]   ;;  %v5837_v57 = vld [vmem:[#allocation7 + $0x430] ss:$28 sps:$4 sm:$0xff]  }
 0x4e2   :  { %4172 = vmatpush1.bf16.msra.mxu0 %v5780_v58  ;;  %4254 = vmatpush1.bf16.msra.mxu1 %v5783_v59  ;;  %v5842_v58 = vld [vmem:[#allocation7 + $0x464] ss:$28 sps:$4 sm:$0xff]   ;;  %v5845_v59 = vld [vmem:[#allocation7 + $0x46c] ss:$28 sps:$4 sm:$0xff]  }
 0x4e3   :  { %4173 = vmatprep.subr.bf16.mxu0 %v5788_v60  ;;  %4255 = vmatprep.subr.bf16.mxu1 %v5791_v61  ;;  %v5840_v60 = vld [vmem:[#allocation7 + $0x460] ss:$28 sps:$4 sm:$0xff]   ;;  %v5843_v61 = vld [vmem:[#allocation7 + $0x468] ss:$28 sps:$4 sm:$0xff]  }
 0x4e6   :  { %4174 = vmatpush1.bf16.msra.mxu0 %v5786_v0  ;;  %4256 = vmatpush1.bf16.msra.mxu1 %v5789_v62  ;;  %v5848_v0 = vld [vmem:[#allocation7 + $0x49c] ss:$28 sps:$4 sm:$0xff]   ;;  %v5851_v62 = vld [vmem:[#allocation7 + $0x4a4] ss:$28 sps:$4 sm:$0xff]  }
 0x4e7   :  { %4175 = vmatprep.subr.bf16.mxu0 %v5794_v63  ;;  %4257 = vmatprep.subr.bf16.mxu1 %v5797_v1  ;;  %v5846_v63 = vld [vmem:[#allocation7 + $0x498] ss:$28 sps:$4 sm:$0xff]   ;;  %v5849_v1 = vld [vmem:[#allocation7 + $0x4a0] ss:$28 sps:$4 sm:$0xff]  }
 0x4ea   :  { %4176 = vmatpush1.bf16.msra.mxu0 %v5792_v2  ;;  %4258 = vmatpush1.bf16.msra.mxu1 %v5795_v3  ;;  %v5854_v2 = vld [vmem:[#allocation7 + $0x4d4] ss:$28 sps:$4 sm:$0xff]   ;;  %v5857_v3 = vld [vmem:[#allocation7 + $0x4dc] ss:$28 sps:$4 sm:$0xff]  }
 0x4eb   :  { %4177 = vmatprep.subr.bf16.mxu0 %v5800_v4  ;;  %4259 = vmatprep.subr.bf16.mxu1 %v5803_v5  ;;  %v5852_v4 = vld [vmem:[#allocation7 + $0x4d0] ss:$28 sps:$4 sm:$0xff]   ;;  %v5855_v5 = vld [vmem:[#allocation7 + $0x4d8] ss:$28 sps:$4 sm:$0xff]  }
 0x4ee   :  { %4178 = vmatpush1.bf16.msra.mxu0 %v5798_v6  ;;  %4260 = vmatpush1.bf16.msra.mxu1 %v5801_v7  ;;  %v5860_v6 = vld [vmem:[#allocation7 + $0x50c] ss:$28 sps:$4 sm:$0xff]   ;;  %v5863_v7 = vld [vmem:[#allocation7 + $0x514] ss:$28 sps:$4 sm:$0xff]  }
 0x4ef   :  { %4179 = vmatprep.subr.bf16.mxu0 %v5806_v8  ;;  %4261 = vmatprep.subr.bf16.mxu1 %v5809_v9  ;;  %v5858_v8 = vld [vmem:[#allocation7 + $0x508] ss:$28 sps:$4 sm:$0xff]   ;;  %v5861_v9 = vld [vmem:[#allocation7 + $0x510] ss:$28 sps:$4 sm:$0xff]  }
 0x4f2   :  { %4180 = vmatpush1.bf16.msra.mxu0 %v5804_v10  ;;  %4262 = vmatpush1.bf16.msra.mxu1 %v5807_v11  ;;  %v5866_v10 = vld [vmem:[#allocation7 + $0x544] ss:$28 sps:$4 sm:$0xff]   ;;  %v5869_v11 = vld [vmem:[#allocation7 + $0x54c] ss:$28 sps:$4 sm:$0xff]  }
 0x4f3   :  { %4181 = vmatprep.subr.bf16.mxu0 %v5812_v12  ;;  %4263 = vmatprep.subr.bf16.mxu1 %v5815_v13  ;;  %v5864_v12 = vld [vmem:[#allocation7 + $0x540] ss:$28 sps:$4 sm:$0xff]   ;;  %v5867_v13 = vld [vmem:[#allocation7 + $0x548] ss:$28 sps:$4 sm:$0xff]  }
 0x4f6   :  { %4182 = vmatpush1.bf16.msra.mxu0 %v5810_v14  ;;  %4264 = vmatpush1.bf16.msra.mxu1 %v5813_v15  ;;  %v5872_v14 = vld [vmem:[#allocation7 + $0x57c] ss:$28 sps:$4 sm:$0xff]   ;;  %v5875_v15 = vld [vmem:[#allocation7 + $0x584] ss:$28 sps:$4 sm:$0xff]  }
 0x4f7   :  { %4192 = vmatprep.subr.bf16.mxu0 %v5818_v17  ;;  %4274 = vmatprep.subr.bf16.mxu1 %v5821_v18  ;;  %v5870_v17 = vld [vmem:[#allocation7 + $0x578] ss:$28 sps:$4 sm:$0xff]   ;;  %v5873_v18 = vld [vmem:[#allocation7 + $0x580] ss:$28 sps:$4 sm:$0xff]  }
 0x58c   :  { %v2650_v26 = vpop.f32.mrb[12].mxu0  ;;  %v6457_v27 = vpop.f32.mrb[16].mxu1 }
 0x58d   :  { %v2651_v28 = vadd.f32 %v2650_v26, %v2439_v20  ;;  %v2652_v16 = vpop.f32.mrb[13].mxu0  ;;  %v2693_v29 = vpop.f32.mrb[17].mxu1  ;;  %v5878_v20 = vld [vmem:[#allocation7 + $0x5b4] ss:$28 sps:$4 sm:$0xff]  }
 0x58e   :  { %v2653_v30 = vadd.f32 %v2652_v16, %v2443_v21  ;;  %v2694_v31 = vadd.f32 %v2693_v29, %v2451_v24  ;;  %v2654_v32 = vpop.f32.mrb[14].mxu0  ;;  %v2695_v33 = vpop.f32.mrb[18].mxu1  ;;  %v5881_v21 = vld [vmem:[#allocation7 + $0x5bc] ss:$28 sps:$4 sm:$0xff]   ;;  %v5876_v24 = vld [vmem:[#allocation7 + $0x5b0] ss:$28 sps:$4 sm:$0xff]  }
 0x58f   :  { %v2698_v34 = vmax.f32 %v2651_v28, 0.0  ;;  %v2655_v35 = vpop.f32.mrb[15].mxu0  ;;  %v2696_v36 = vpop.f32.mrb[19].mxu1  ;;  %v5879_v26 = vld [vmem:[#allocation7 + $0x5b8] ss:$28 sps:$4 sm:$0xff]  }
 0x590   :  { %v2699_v37 = vmax.f32 %v2653_v30, 0.0  ;;  %v2701_v38 = vmax.f32 %v2694_v31, 0.0  ;;  %v5884_v28 = vld [vmem:[#allocation7 + $0x5ec] ss:$28 sps:$4 sm:$0xff]   ;;  %v5887_v16 = vld [vmem:[#allocation7 + $0x5f4] ss:$28 sps:$4 sm:$0xff]  }
 0x591   :  { %v6461_v44 = vpack.c.bf16 %v2698_v34, %v2698_v34  ;;  %v5882_v29 = vld [vmem:[#allocation7 + $0x5e8] ss:$28 sps:$4 sm:$0xff]   ;;  %v5885_v30 = vld [vmem:[#allocation7 + $0x5f0] ss:$28 sps:$4 sm:$0xff]   ;;  %v5888_v33 = vld [vmem:[#allocation7 + $0x620] ss:$28 sps:$4 sm:$0xff]  }
 0x592   :  { %v6459_v41 = vpack.c.bf16 %v2699_v37, %v2699_v37  ;;  %v6465_v47 = vpack.c.bf16 %v2701_v38, %v2701_v38  ;;  %v5890_v31 = vld [vmem:[#allocation7 + $0x624] ss:$28 sps:$4 sm:$0xff]   ;;  %v5893_v32 = vld [vmem:[#allocation7 + $0x62c] ss:$28 sps:$4 sm:$0xff]   ;;  %v5896_v35 = vld [vmem:[#allocation7 + $0x65c] ss:$28 sps:$4 sm:$0xff]  }
 0x593   :  { %v5891_v34 = vld [vmem:[#allocation7 + $0x628] ss:$28 sps:$4 sm:$0xff]   ;;  %v5894_v37 = vld [vmem:[#allocation7 + $0x658] ss:$28 sps:$4 sm:$0xff]   ;;  %v5897_v38 = vld [vmem:[#allocation7 + $0x660] ss:$28 sps:$4 sm:$0xff]  }
 0x594   :  { %4183 = vmatprep.mubr.bf16.mxu0 %v6459_v41  ;;  %4265 = vmatprep.mubr.bf16.mxu1 %v6459_v41  ;;  %v5899_v36 = vld [vmem:[#allocation7 + $0x664] ss:$28 sps:$4 sm:$0xff]  }
 0x595   :  { %4184 = vmatmul.mubr.bf16.vlgmr.msra.gmra.mrb[16].mxu0 %v6461_v44  ;;  %4266 = vmatmul.mubr.bf16.vlgmr.msra.gmra.mrb[20].mxu1 %v6461_v44 }
 0x596   :  { %4193 = vmatpush1.bf16.msra.mxu0 %v5816_v42  ;;  %4275 = vmatpush1.bf16.msra.mxu1 %v5819_v43  ;;  %v2447_v42 = vrot.slane %v6449_v19, %v6362_v39  ;;  %v5902_v43 = vld [vmem:[#allocation7 + $0x694] ss:$28 sps:$4 sm:$0xff]  }
 0x597   :  { %4224 = vmatprep.mubr.bf16.mxu0 %v6465_v47  ;;  %4306 = vmatprep.mubr.bf16.mxu1 %v6465_v47  ;;  %v5914_v19 = vld [vmem:[#allocation7 + $0x14] ss:$28 sps:$4 sm:$0xff]  }
 0x598   :  { %4194 = vmatprep.subr.bf16.mxu0 %v5824_v45  ;;  %4276 = vmatprep.subr.bf16.mxu1 %v5827_v46  ;;  %v5905_v45 = vld [vmem:[#allocation7 + $0x69c] ss:$28 sps:$4 sm:$0xff]   ;;  %v5900_v46 = vld [vmem:[#allocation7 + $0x690] ss:$28 sps:$4 sm:$0xff]  }
 0x59a   :  { %4195 = vmatpush1.bf16.msra.mxu0 %v5822_v48  ;;  %4277 = vmatpush1.bf16.msra.mxu1 %v5825_v49  ;;  %v5903_v48 = vld [vmem:[#allocation7 + $0x698] ss:$28 sps:$4 sm:$0xff]   ;;  %v2692_v49 = vadd.f32 %v6457_v27, %v2447_v42  ;;  %v5970_v42 = vld [vmem:[#allocation7 + $0x600] ss:$28 sps:$4 sm:$0xff]  }
 0x59b   :  { %4196 = vmatprep.subr.bf16.mxu0 %v5830_v50  ;;  %4278 = vmatprep.subr.bf16.mxu1 %v5833_v51  ;;  %v5908_v50 = vld [vmem:[#allocation7 + $0x6cc] ss:$28 sps:$4 sm:$0xff]   ;;  %v5911_v51 = vld [vmem:[#allocation7 + $0x6d4] ss:$28 sps:$4 sm:$0xff]  }
 0x59c   :  { %v5916_v27 = vld [vmem:[#allocation7 + $0x18] ss:$28 sps:$4 sm:$0xff]  }
 0x59e   :  { %4197 = vmatpush1.bf16.msra.mxu0 %v5828_v52  ;;  %4279 = vmatpush1.bf16.msra.mxu1 %v5831_v53  ;;  %v5906_v52 = vld [vmem:[#allocation7 + $0x6c8] ss:$28 sps:$4 sm:$0xff]   ;;  %v5909_v53 = vld [vmem:[#allocation7 + $0x6d0] ss:$28 sps:$4 sm:$0xff]  }
 0x59f   :  { %4198 = vmatprep.subr.bf16.mxu0 %v5836_v54  ;;  %4280 = vmatprep.subr.bf16.mxu1 %v5839_v55  ;;  %v2700_v54 = vmax.f32 %v2692_v49, 0.0  ;;  %v5915_v55 = vld [vmem:[#allocation7 + $0x1d8] ss:$28 sps:$4 sm:$0xff]   ;;  %v5972_v49 = vld [vmem:[#allocation7 + $0x2b0] ss:$28 sps:$4 sm:$0xff]  }
 0x5a2   :  { %4199 = vmatpush1.bf16.msra.mxu0 %v5834_v56  ;;  %4281 = vmatpush1.bf16.msra.mxu1 %v5837_v57  ;;  %v5912_v56 = vld [vmem:[#allocation7 + $0x10] ss:$28 sps:$4 sm:$0xff]   ;;  %v6474_v57 = vpack.c.bf16 %v2700_v54, %v2700_v54 }
 0x5a3   :  { %4200 = vmatprep.subr.bf16.mxu0 %v5842_v58  ;;  %4282 = vmatprep.subr.bf16.mxu1 %v5845_v59  ;;  %v5919_v58 = vld [vmem:[#allocation7 + $0x4c] ss:$28 sps:$4 sm:$0xff]  }
 0x5a4   :  { %v5920_v59 = vld [vmem:[#allocation7 + $0x210] ss:$28 sps:$4 sm:$0xff]  }
 0x5a5   :  { %v5981_v54 = vld [vmem:[#allocation7 + $0x4b0] ss:$28 sps:$4 sm:$0xff]  }
 0x5a6   :  { %4201 = vmatpush1.bf16.msra.mxu0 %v5840_v60  ;;  %4283 = vmatpush1.bf16.msra.mxu1 %v5843_v61  ;;  %v5917_v60 = vld [vmem:[#allocation7 + $0x48] ss:$28 sps:$4 sm:$0xff]   ;;  %v5921_v61 = vld [vmem:[#allocation7 + $0x50] ss:$28 sps:$4 sm:$0xff]  }
 0x5a7   :  { %4202 = vmatprep.subr.bf16.mxu0 %v5848_v0  ;;  %4284 = vmatprep.subr.bf16.mxu1 %v5851_v62  ;;  %v5924_v0 = vld [vmem:[#allocation7 + $0x84] ss:$28 sps:$4 sm:$0xff]  }
 0x5a8   :  { %v5925_v62 = vld [vmem:[#allocation7 + $0x248] ss:$28 sps:$4 sm:$0xff]  }
 0x5aa   :  { %4203 = vmatpush1.bf16.msra.mxu0 %v5846_v63  ;;  %4285 = vmatpush1.bf16.msra.mxu1 %v5849_v1  ;;  %v5922_v63 = vld [vmem:[#allocation7 + $0x80] ss:$28 sps:$4 sm:$0xff]   ;;  %v5926_v1 = vld [vmem:[#allocation7 + $0x88] ss:$28 sps:$4 sm:$0xff]  }
 0x5ab   :  { %4204 = vmatprep.subr.bf16.mxu0 %v5854_v2  ;;  %4286 = vmatprep.subr.bf16.mxu1 %v5857_v3  ;;  %v5929_v2 = vld [vmem:[#allocation7 + $0xbc] ss:$28 sps:$4 sm:$0xff]  }
 0x5ac   :  { %v5930_v3 = vld [vmem:[#allocation7 + $0x280] ss:$28 sps:$4 sm:$0xff]  }
 0x5ae   :  { %4205 = vmatpush1.bf16.msra.mxu0 %v5852_v4  ;;  %4287 = vmatpush1.bf16.msra.mxu1 %v5855_v5  ;;  %v5927_v4 = vld [vmem:[#allocation7 + $0xb8] ss:$28 sps:$4 sm:$0xff]   ;;  %v5931_v5 = vld [vmem:[#allocation7 + $0xc0] ss:$28 sps:$4 sm:$0xff]  }
 0x5af   :  { %4206 = vmatprep.subr.bf16.mxu0 %v5860_v6  ;;  %4288 = vmatprep.subr.bf16.mxu1 %v5863_v7  ;;  %v5934_v6 = vld [vmem:[#allocation7 + $0xf4] ss:$28 sps:$4 sm:$0xff]  }
 0x5b0   :  { %v5932_v7 = vld [vmem:[#allocation7 + $0xf0] ss:$28 sps:$4 sm:$0xff]  }
 0x5b2   :  { %4207 = vmatpush1.bf16.msra.mxu0 %v5858_v8  ;;  %4289 = vmatpush1.bf16.msra.mxu1 %v5861_v9  ;;  %v5936_v8 = vld [vmem:[#allocation7 + $0xf8] ss:$28 sps:$4 sm:$0xff]   ;;  %v5939_v9 = vld [vmem:[#allocation7 + $0x12c] ss:$28 sps:$4 sm:$0xff]  }
 0x5b3   :  { %4208 = vmatprep.subr.bf16.mxu0 %v5866_v10  ;;  %4290 = vmatprep.subr.bf16.mxu1 %v5869_v11  ;;  %v5940_v10 = vld [vmem:[#allocation7 + $0x2f0] ss:$28 sps:$4 sm:$0xff]   ;;  %v5937_v11 = vld [vmem:[#allocation7 + $0x128] ss:$28 sps:$4 sm:$0xff]  }
 0x5b6   :  { %4209 = vmatpush1.bf16.msra.mxu0 %v5864_v12  ;;  %4291 = vmatpush1.bf16.msra.mxu1 %v5867_v13  ;;  %v5941_v12 = vld [vmem:[#allocation7 + $0x130] ss:$28 sps:$4 sm:$0xff]   ;;  %v5944_v13 = vld [vmem:[#allocation7 + $0x164] ss:$28 sps:$4 sm:$0xff]  }
 0x5b7   :  { %4210 = vmatprep.subr.bf16.mxu0 %v5872_v14  ;;  %4292 = vmatprep.subr.bf16.mxu1 %v5875_v15  ;;  %v5945_v14 = vld [vmem:[#allocation7 + $0x328] ss:$28 sps:$4 sm:$0xff]   ;;  %v5942_v15 = vld [vmem:[#allocation7 + $0x160] ss:$28 sps:$4 sm:$0xff]  }
 0x5ba   :  { %4211 = vmatpush1.bf16.msra.mxu0 %v5870_v17  ;;  %4293 = vmatpush1.bf16.msra.mxu1 %v5873_v18  ;;  %v5946_v17 = vld [vmem:[#allocation7 + $0x168] ss:$28 sps:$4 sm:$0xff]   ;;  %v5949_v18 = vld [vmem:[#allocation7 + $0x19c] ss:$28 sps:$4 sm:$0xff]  }
 0x5bb   :  { %4212 = vmatprep.subr.bf16.mxu0 %v5878_v20  ;;  %4294 = vmatprep.subr.bf16.mxu1 %v5881_v21  ;;  %v5950_v20 = vld [vmem:[#allocation7 + $0x360] ss:$28 sps:$4 sm:$0xff]   ;;  %v5947_v21 = vld [vmem:[#allocation7 + $0x198] ss:$28 sps:$4 sm:$0xff]  }
 0x5be   :  { %4213 = vmatpush1.bf16.msra.mxu0 %v5876_v24  ;;  %4295 = vmatpush1.bf16.msra.mxu1 %v5879_v26  ;;  %v5951_v24 = vld [vmem:[#allocation7 + $0x1a0] ss:$28 sps:$4 sm:$0xff]   ;;  %v5954_v26 = vld [vmem:[#allocation7 + $0x1d4] ss:$28 sps:$4 sm:$0xff]  }
 0x5bf   :  { %4214 = vmatprep.subr.bf16.mxu0 %v5884_v28  ;;  %4296 = vmatprep.subr.bf16.mxu1 %v5887_v16  ;;  %v5955_v28 = vld [vmem:[#allocation7 + $0x558] ss:$28 sps:$4 sm:$0xff]   ;;  %v5952_v16 = vld [vmem:[#allocation7 + $0x1d0] ss:$28 sps:$4 sm:$0xff]  }
 0x5c2   :  { %4215 = vmatpush1.bf16.msra.mxu0 %v5882_v29  ;;  %4297 = vmatpush1.bf16.msra.mxu1 %v5885_v30  ;;  %v5956_v29 = vld [vmem:[#allocation7 + $0x398] ss:$28 sps:$4 sm:$0xff]   ;;  %v5959_v30 = vld [vmem:[#allocation7 + $0x20c] ss:$28 sps:$4 sm:$0xff]  }
 0x5c3   :  { %4216 = vmatprep.subr.bf16.mxu0 %v5890_v31  ;;  %4298 = vmatprep.subr.bf16.mxu1 %v5893_v32  ;;  %v5960_v31 = vld [vmem:[#allocation7 + $0x590] ss:$28 sps:$4 sm:$0xff]   ;;  %v5957_v32 = vld [vmem:[#allocation7 + $0x208] ss:$28 sps:$4 sm:$0xff]  }
 0x5c6   :  { %4217 = vmatpush1.bf16.msra.mxu0 %v5888_v33  ;;  %4299 = vmatpush1.bf16.msra.mxu1 %v5891_v34  ;;  %v5961_v33 = vld [vmem:[#allocation7 + $0x3d0] ss:$28 sps:$4 sm:$0xff]   ;;  %v5964_v34 = vld [vmem:[#allocation7 + $0x244] ss:$28 sps:$4 sm:$0xff]  }
 0x5c7   :  { %4218 = vmatprep.subr.bf16.mxu0 %v5896_v35  ;;  %4300 = vmatprep.subr.bf16.mxu1 %v5899_v36  ;;  %v5965_v35 = vld [vmem:[#allocation7 + $0x5c8] ss:$28 sps:$4 sm:$0xff]   ;;  %v5962_v36 = vld [vmem:[#allocation7 + $0x240] ss:$28 sps:$4 sm:$0xff]  }
 0x5ca   :  { %4219 = vmatpush1.bf16.msra.mxu0 %v5894_v37  ;;  %4301 = vmatpush1.bf16.msra.mxu1 %v5897_v38  ;;  %v5966_v37 = vld [vmem:[#allocation7 + $0x408] ss:$28 sps:$4 sm:$0xff]   ;;  %v5969_v38 = vld [vmem:[#allocation7 + $0x27c] ss:$28 sps:$4 sm:$0xff]  }
 0x5cb   :  { %4220 = vmatprep.subr.bf16.mxu0 %v5902_v43  ;;  %4302 = vmatprep.subr.bf16.mxu1 %v5905_v45  ;;  %v5967_v43 = vld [vmem:[#allocation7 + $0x278] ss:$28 sps:$4 sm:$0xff]   ;;  %v5971_v45 = vld [vmem:[#allocation7 + $0x440] ss:$28 sps:$4 sm:$0xff]  }
 0x5ce   :  { %4221 = vmatpush1.bf16.msra.mxu0 %v5900_v46  ;;  %4303 = vmatpush1.bf16.msra.mxu1 %v5903_v48  ;;  %v5974_v46 = vld [vmem:[#allocation7 + $0x2b4] ss:$28 sps:$4 sm:$0xff]  }
 0x5cf   :  { %4222 = vmatprep.subr.bf16.mxu0 %v5908_v50  ;;  %4304 = vmatprep.subr.bf16.mxu1 %v5911_v51  ;;  %v5975_v48 = vld [vmem:[#allocation7 + $0x638] ss:$28 sps:$4 sm:$0xff]   ;;  %v5979_v51 = vld [vmem:[#allocation7 + $0x2ec] ss:$28 sps:$4 sm:$0xff]  }
 0x5d0   :  { %v5976_v50 = vld [vmem:[#allocation7 + $0x478] ss:$28 sps:$4 sm:$0xff]  }
 0x5d2   :  { %4223 = vmatpush1.bf16.msra.mxu0 %v5906_v52  ;;  %4305 = vmatpush1.bf16.msra.mxu1 %v5909_v53  ;;  %v5980_v52 = vld [vmem:[#allocation7 + $0x670] ss:$28 sps:$4 sm:$0xff]   ;;  %v5977_v53 = vld [vmem:[#allocation7 + $0x2e8] ss:$28 sps:$4 sm:$0xff]  }
 0x5d3   :  { %4315 = vmatprep.subr.bf16.mxu0 %v5914_v19  ;;  %5140 = vmatprep.subr.bf16.mxu1 %v5915_v55  ;;  %v5984_v19 = vld [vmem:[#allocation7 + $0x324] ss:$28 sps:$4 sm:$0xff]  }
 0x5d4   :  { %v5985_v55 = vld [vmem:[#allocation7 + $0x6a8] ss:$28 sps:$4 sm:$0xff]  }
 0x5d5   :  { %4225 = vmatmul.mubr.bf16.vlgmr.msra.gmra.mrb[16].mxu0 %v6474_v57  ;;  %4307 = vmatmul.mubr.bf16.vlgmr.msra.gmra.mrb[20].mxu1 %v6474_v57 }
 0x5d6   :  { %4316 = vmatpush1.bf16.msra.mxu0 %v5912_v56  ;;  %4347 = vmatprep.mubr.bf16.mxu0 %v6459_v41  ;;  %v5982_v56 = vld [vmem:[#allocation7 + $0x320] ss:$28 sps:$4 sm:$0xff]  }
 0x5d7   :  { %5141 = vmatpush3.bf16.msra.mxu1 %v5916_v27  ;;  %4429 = vmatprep.mubr.bf16.mxu1 %v6459_v41  ;;  %v5935_v41 = vld [vmem:[#allocation7 + $0x2b8] ss:$28 sps:$4 sm:$0xff]   ;;  %v5986_v27 = vld [vmem:[#allocation7 + $0x4e8] ss:$28 sps:$4 sm:$0xff]  }
 0x5d8   :  { %4317 = vmatprep.subr.bf16.mxu0 %v5919_v58  ;;  %5142 = vmatprep.subr.bf16.mxu1 %v5920_v59  ;;  %v5989_v58 = vld [vmem:[#allocation7 + $0x35c] ss:$28 sps:$4 sm:$0xff]  }
 0x5d9   :  { %v5990_v59 = vld [vmem:[#allocation7 + $0x6e0] ss:$28 sps:$4 sm:$0xff]  }
 0x5da   :  { %4318 = vmatpush1.bf16.msra.mxu0 %v5917_v60  ;;  %v5987_v60 = vld [vmem:[#allocation7 + $0x358] ss:$28 sps:$4 sm:$0xff]  }
 0x5db   :  { %5143 = vmatpush3.bf16.msra.mxu1 %v5921_v61  ;;  %4319 = vmatprep.subr.bf16.mxu0 %v5924_v0  ;;  %v5991_v61 = vld [vmem:[#allocation7 + $0x520] ss:$28 sps:$4 sm:$0xff]   ;;  %v5994_v0 = vld [vmem:[#allocation7 + $0x394] ss:$28 sps:$4 sm:$0xff]  }
 0x5dc   :  { %5144 = vmatprep.subr.bf16.mxu1 %v5925_v62  ;;  %v5992_v62 = vld [vmem:[#allocation7 + $0x390] ss:$28 sps:$4 sm:$0xff]  }
 0x5de   :  { %4320 = vmatpush1.bf16.msra.mxu0 %v5922_v63  ;;  %v5997_v63 = vld [vmem:[#allocation7 + $0x3cc] ss:$28 sps:$4 sm:$0xff]  }
 0x5df   :  { %5145 = vmatpush3.bf16.msra.mxu1 %v5926_v1  ;;  %4321 = vmatprep.subr.bf16.mxu0 %v5929_v2  ;;  %v5995_v1 = vld [vmem:[#allocation7 + $0x3c8] ss:$28 sps:$4 sm:$0xff]  }
 0x5e0   :  { %5146 = vmatprep.subr.bf16.mxu1 %v5930_v3  ;;  %v6000_v2 = vld [vmem:[#allocation7 + $0x404] ss:$28 sps:$4 sm:$0xff]  }
 0x5e1   :  { %v5998_v3 = vld [vmem:[#allocation7 + $0x400] ss:$28 sps:$4 sm:$0xff]  }
 0x5e2   :  { %4322 = vmatpush1.bf16.msra.mxu0 %v5927_v4  ;;  %v6003_v4 = vld [vmem:[#allocation7 + $0x43c] ss:$28 sps:$4 sm:$0xff]  }
 0x5e3   :  { %5147 = vmatpush3.bf16.msra.mxu1 %v5931_v5  ;;  %4323 = vmatprep.subr.bf16.mxu0 %v5934_v6  ;;  %v6001_v5 = vld [vmem:[#allocation7 + $0x438] ss:$28 sps:$4 sm:$0xff]  }
 0x5e4   :  { %5148 = vmatprep.subr.bf16.mxu1 %v5935_v41  ;;  %v6006_v6 = vld [vmem:[#allocation7 + $0x474] ss:$28 sps:$4 sm:$0xff]  }
 0x5e5   :  { %v6004_v41 = vld [vmem:[#allocation7 + $0x470] ss:$28 sps:$4 sm:$0xff]  }
 0x5e6   :  { %4324 = vmatpush1.bf16.msra.mxu0 %v5932_v7  ;;  %v6007_v7 = vld [vmem:[#allocation7 + $0x4a8] ss:$28 sps:$4 sm:$0xff]  }
 0x5e7   :  { %5149 = vmatpush3.bf16.msra.mxu1 %v5936_v8  ;;  %4325 = vmatprep.subr.bf16.mxu0 %v5939_v9  ;;  %v6012_v8 = vld [vmem:[#allocation7 + $0x4e4] ss:$28 sps:$4 sm:$0xff]   ;;  %v6015_v9 = vld [vmem:[#allocation7 + $0x51c] ss:$28 sps:$4 sm:$0xff]  }
 0x5e8   :  { %5150 = vmatprep.subr.bf16.mxu1 %v5940_v10  ;;  %v6013_v10 = vld [vmem:[#allocation7 + $0x518] ss:$28 sps:$4 sm:$0xff]  }
 0x5ea   :  { %4326 = vmatpush1.bf16.msra.mxu0 %v5937_v11  ;;  %v6018_v11 = vld [vmem:[#allocation7 + $0x554] ss:$28 sps:$4 sm:$0xff]  }
 0x5eb   :  { %5151 = vmatpush3.bf16.msra.mxu1 %v5941_v12  ;;  %4327 = vmatprep.subr.bf16.mxu0 %v5944_v13  ;;  %v6016_v12 = vld [vmem:[#allocation7 + $0x550] ss:$28 sps:$4 sm:$0xff]  }
 0x5ec   :  { %5152 = vmatprep.subr.bf16.mxu1 %v5945_v14  ;;  %v6021_v13 = vld [vmem:[#allocation7 + $0x58c] ss:$28 sps:$4 sm:$0xff]  }
 0x5ed   :  { %v6019_v14 = vld [vmem:[#allocation7 + $0x588] ss:$28 sps:$4 sm:$0xff]  }
 0x5ee   :  { %4328 = vmatpush1.bf16.msra.mxu0 %v5942_v15  ;;  %v6024_v15 = vld [vmem:[#allocation7 + $0x5c4] ss:$28 sps:$4 sm:$0xff]  }
 0x5ef   :  { %5153 = vmatpush3.bf16.msra.mxu1 %v5946_v17  ;;  %4329 = vmatprep.subr.bf16.mxu0 %v5949_v18  ;;  %v6022_v17 = vld [vmem:[#allocation7 + $0x5c0] ss:$28 sps:$4 sm:$0xff]  }
 0x5f0   :  { %5154 = vmatprep.subr.bf16.mxu1 %v5950_v20  ;;  %v6027_v18 = vld [vmem:[#allocation7 + $0x5fc] ss:$28 sps:$4 sm:$0xff]  }
 0x5f1   :  { %v6025_v20 = vld [vmem:[#allocation7 + $0x5f8] ss:$28 sps:$4 sm:$0xff]  }
 0x5f2   :  { %4330 = vmatpush1.bf16.msra.mxu0 %v5947_v21  ;;  %v6030_v21 = vld [vmem:[#allocation7 + $0x634] ss:$28 sps:$4 sm:$0xff]  }
 0x5f3   :  { %5155 = vmatpush3.bf16.msra.mxu1 %v5951_v24  ;;  %4331 = vmatprep.subr.bf16.mxu0 %v5954_v26  ;;  %v6028_v24 = vld [vmem:[#allocation7 + $0x630] ss:$28 sps:$4 sm:$0xff]  }
 0x5f4   :  { %5162 = vmatprep.subr.bf16.mxu1 %v5955_v28  ;;  %v6033_v26 = vld [vmem:[#allocation7 + $0x66c] ss:$28 sps:$4 sm:$0xff]  }
 0x5f5   :  { %v6031_v28 = vld [vmem:[#allocation7 + $0x668] ss:$28 sps:$4 sm:$0xff]  }
 0x5f6   :  { %4430 = vmatmul.mubr.bf16.vlgmr.msra.gmra.mrb[24].mxu1 %v6461_v44  ;;  %4332 = vmatpush1.bf16.msra.mxu0 %v5952_v16  ;;  %v6036_v16 = vld [vmem:[#allocation7 + $0x6a4] ss:$28 sps:$4 sm:$0xff]  }
 0x5f7   :  { %5163 = vmatpush3.bf16.msra.mxu1 %v5956_v29  ;;  %4469 = vmatprep.mubr.bf16.mxu1 %v6465_v47  ;;  %v6034_v29 = vld [vmem:[#allocation7 + $0x6a0] ss:$28 sps:$4 sm:$0xff]  }
 0x5f8   :  { %4333 = vmatprep.subr.bf16.mxu0 %v5959_v30  ;;  %5164 = vmatprep.subr.bf16.mxu1 %v5960_v31  ;;  %v6039_v30 = vld [vmem:[#allocation7 + $0x6dc] ss:$28 sps:$4 sm:$0xff]  }
 0x5f9   :  { %v6037_v31 = vld [vmem:[#allocation7 + $0x6d8] ss:$28 sps:$4 sm:$0xff]  }
 0x5fa   :  { %4334 = vmatpush1.bf16.msra.mxu0 %v5957_v32  ;;  %v6489_v32 = vld [vmem:[%s6538_s12] sm:$0xff] }
 0x5fb   :  { %5165 = vmatpush3.bf16.msra.mxu1 %v5961_v33  ;;  %4335 = vmatprep.subr.bf16.mxu0 %v5964_v34  ;;  %v2967_v33 = vrot.slane %v6489_v32, %v6349_v23  ;;  %v2975_v34 = vrot.slane %v6489_v32, %v6362_v39 }
 0x5fc   :  { %5166 = vmatprep.subr.bf16.mxu1 %v5965_v35  ;;  %v2971_v35 = vrot.slane %v6489_v32, %v6355_v25 }
 0x5fe   :  { %4336 = vmatpush1.bf16.msra.mxu0 %v5962_v36  ;;  %v2979_v36 = vrot.slane %v6489_v32, %v6365_v40 }
 0x5ff   :  { %5167 = vmatpush3.bf16.msra.mxu1 %v5966_v37  ;;  %4337 = vmatprep.subr.bf16.mxu0 %v5969_v38 }
 0x600   :  { %5168 = vmatprep.subr.bf16.mxu1 %v5970_v42 }
 0x602   :  { %4338 = vmatpush1.bf16.msra.mxu0 %v5967_v43 }
 0x603   :  { %5169 = vmatpush3.bf16.msra.mxu1 %v5971_v45  ;;  %4339 = vmatprep.subr.bf16.mxu0 %v5974_v46 }
 0x604   :  { %5170 = vmatprep.subr.bf16.mxu1 %v5975_v48 }
 0x606   :  { %4340 = vmatpush1.bf16.msra.mxu0 %v5972_v49 }
 0x607   :  { %5171 = vmatpush3.bf16.msra.mxu1 %v5976_v50  ;;  %4341 = vmatprep.subr.bf16.mxu0 %v5979_v51 }
 0x608   :  { %5172 = vmatprep.subr.bf16.mxu1 %v5980_v52 }
 0x60a   :  { %4342 = vmatpush1.bf16.msra.mxu0 %v5977_v53 }
 0x60b   :  { %5173 = vmatpush3.bf16.msra.mxu1 %v5981_v54  ;;  %4343 = vmatprep.subr.bf16.mxu0 %v5984_v19 }
 0x60c   :  { %5174 = vmatprep.subr.bf16.mxu1 %v5985_v55 }
 0x60e   :  { %4344 = vmatpush1.bf16.msra.mxu0 %v5982_v56 }
 0x60f   :  { %5175 = vmatpush3.bf16.msra.mxu1 %v5986_v27  ;;  %4345 = vmatprep.subr.bf16.mxu0 %v5989_v58 }
 0x610   :  { %5176 = vmatprep.subr.bf16.mxu1 %v5990_v59 }
 0x612   :  { %4346 = vmatpush1.bf16.msra.mxu0 %v5987_v60 }
 0x613   :  { %5177 = vmatpush3.bf16.msra.mxu1 %v5991_v61  ;;  %4356 = vmatprep.subr.bf16.mxu0 %v5994_v0 }
 0x615   :  { %4348 = vmatmul.mubr.bf16.vlgmr.msra.gmra.mrb[20].mxu0 %v6461_v44  ;;  %v6009_v44 = vld [vmem:[#allocation7 + $0x4ac] ss:$28 sps:$4 sm:$0xff]  }
 0x616   :  { %4470 = vmatmul.mubr.bf16.vlgmr.msra.gmra.mrb[28].mxu1 %v6474_v57  ;;  %4357 = vmatpush1.bf16.msra.mxu0 %v5992_v62 }
 0x617   :  { %4388 = vmatprep.mubr.bf16.mxu0 %v6465_v47  ;;  %4358 = vmatprep.subr.bf16.mxu0 %v5997_v63  ;;  %v6010_v47 = vld [vmem:[#allocation7 + $0x4e0] ss:$28 sps:$4 sm:$0xff]  }
 0x61a   :  { %4359 = vmatpush1.bf16.msra.mxu0 %v5995_v1 }
 0x61b   :  { %4360 = vmatprep.subr.bf16.mxu0 %v6000_v2 }
 0x61e   :  { %4361 = vmatpush1.bf16.msra.mxu0 %v5998_v3 }
 0x61f   :  { %4362 = vmatprep.subr.bf16.mxu0 %v6003_v4 }
 0x622   :  { %4363 = vmatpush1.bf16.msra.mxu0 %v6001_v5  ;;  %v2990_v5 = vsub.s32 6, %v6346_v22 }
 0x623   :  { %4364 = vmatprep.subr.bf16.mxu0 %v6006_v6 }
 0x624   :  { %v2991_v6 = vrot.slane %v6489_v32, %v2990_v5 }
 0x626   :  { %4365 = vmatpush1.bf16.msra.mxu0 %v6004_v41 }
 0x627   :  { %4366 = vmatprep.subr.bf16.mxu0 %v6009_v44 }
 0x62a   :  { %4367 = vmatpush1.bf16.msra.mxu0 %v6007_v7 }
 0x62b   :  { %4368 = vmatprep.subr.bf16.mxu0 %v6012_v8 }
 0x62e   :  { %4369 = vmatpush1.bf16.msra.mxu0 %v6010_v47 }
 0x62f   :  { %4370 = vmatprep.subr.bf16.mxu0 %v6015_v9 }
 0x632   :  { %4371 = vmatpush1.bf16.msra.mxu0 %v6013_v10 }
 0x633   :  { %4372 = vmatprep.subr.bf16.mxu0 %v6018_v11 }
 0x636   :  { %4373 = vmatpush1.bf16.msra.mxu0 %v6016_v12 }
 0x637   :  { %4374 = vmatprep.subr.bf16.mxu0 %v6021_v13 }
 0x63a   :  { %4375 = vmatpush1.bf16.msra.mxu0 %v6019_v14 }
 0x63b   :  { %4376 = vmatprep.subr.bf16.mxu0 %v6024_v15  ;;  %v2982_v15 = vsub.s32 4, %v6346_v22 }
 0x63e   :  { %4377 = vmatpush1.bf16.msra.mxu0 %v6022_v17  ;;  %v2986_v17 = vsub.s32 5, %v6346_v22 }
 0x63f   :  { %4378 = vmatprep.subr.bf16.mxu0 %v6027_v18  ;;  %v2983_v18 = vrot.slane %v6489_v32, %v2982_v15 }
 0x642   :  { %4379 = vmatpush1.bf16.msra.mxu0 %v6025_v20  ;;  %v2987_v20 = vrot.slane %v6489_v32, %v2986_v17 }
 0x643   :  { %4380 = vmatprep.subr.bf16.mxu0 %v6030_v21 }
 0x646   :  { %4381 = vmatpush1.bf16.msra.mxu0 %v6028_v24 }
 0x647   :  { %4382 = vmatprep.subr.bf16.mxu0 %v6033_v26 }
 0x64a   :  { %4383 = vmatpush1.bf16.msra.mxu0 %v6031_v28 }
 0x64b   :  { %4384 = vmatprep.subr.bf16.mxu0 %v6036_v16 }
 0x64e   :  { %4385 = vmatpush1.bf16.msra.mxu0 %v6034_v29 }
 0x64f   :  { %4386 = vmatprep.subr.bf16.mxu0 %v6039_v30 }
 0x652   :  { %4387 = vmatpush1.bf16.msra.mxu0 %v6037_v31 }
 0x655   :  { %4389 = vmatmul.mubr.bf16.vlgmr.msra.gmra.mrb[20].mxu0 %v6474_v57 }
 0x6a8   :  { %v4226_v37 = vpop.f32.mrb[16].mxu0  ;;  %v4308_v38 = vpop.f32.mrb[20].mxu1 }
 0x6a9   :  { %v5230_v57 = vadd.f32 %v4226_v37, %v2967_v33  ;;  %v5232_v42 = vadd.f32 %v4308_v38, %v2975_v34  ;;  %v4228_v43 = vpop.f32.mrb[17].mxu0  ;;  %v4310_v45 = vpop.f32.mrb[21].mxu1 }
 0x6aa   :  { %v5231_v46 = vadd.f32 %v4228_v43, %v2971_v35  ;;  %v5233_v48 = vadd.f32 %v4310_v45, %v2979_v36  ;;  %v4230_v49 = vpop.f32.mrb[18].mxu0  ;;  %v4312_v50 = vpop.f32.mrb[22].mxu1 }
 0x6ab   :  { %v5071_v23 = vmul.f32 -1.442695, %v5230_v57  ;;  %v5073_v51 = vmul.f32 -1.442695, %v5232_v42  ;;  %v4231_v52 = vpop.f32.mrb[19].mxu0  ;;  %v4313_v39 = vpop.f32.mrb[23].mxu1 }
 0x6ac   :  { %v5072_v53 = vmul.f32 -1.442695, %v5231_v46  ;;  %v5074_v54 = vmul.f32 -1.442695, %v5233_v48 }
 0x6ad   :  { %6040 = vpow2.f32 %v5071_v23 }
 0x6ae   :  { %6042 = vpow2.f32 %v5073_v51 }
 0x6af   :  { %6044 = vpow2.f32 %v5072_v53 }
 0x6b0   :  { %6046 = vpow2.f32 %v5074_v54 }
 0x6b7   :  { %v6041_v25 = vpop.eup %6040 }
 0x6b8   :  { %v6043_v40 = vpop.eup %6042  ;;  %v4498_v19 = vadd.f32 1.0, %v6041_v25 }
 0x6b9   :  { %v6045_v55 = vpop.eup %6044  ;;  %v4500_v56 = vadd.f32 1.0, %v6043_v40 }
 0x6ba   :  { %v6047_v27 = vpop.eup %6046  ;;  %6048 = vrcp.f32 %v4498_v19  ;;  %v4499_v58 = vadd.f32 1.0, %v6045_v55 }
 0x6bb   :  { %6050 = vrcp.f32 %v4500_v56  ;;  %v4501_v59 = vadd.f32 1.0, %v6047_v27 }
 0x6bc   :  { %6052 = vrcp.f32 %v4499_v58 }
 0x6bd   :  { %6054 = vrcp.f32 %v4501_v59 }
 0x6c4   :  { %v6049_v60 = vpop.eup %6048 }
 0x6c5   :  { %v6051_v61 = vpop.eup %6050  ;;  %4519 = vst [vmem:[%s6539_s13] sm:$0xff] %v6049_v60 }
 0x6c6   :  { %v6053_v0 = vpop.eup %6052  ;;  %4521 = vst [vmem:[%s6539_s13 + $0x10] sm:$0xff] %v6051_v61 }
 0x6c7   :  { %v6055_v62 = vpop.eup %6054  ;;  %4520 = vst [vmem:[%s6539_s13 + $0x8] sm:$0xff] %v6053_v0 }
 0x6c8   :  { %4522 = vst [vmem:[%s6539_s13 + $0x18] sm:$0xff] %v6055_v62 }
 0x6c9   :  { %v5156_v63 = vpop.f32.mrb[24].mxu1 }
 0x6ca   :  { %v5157_v1 = vpop.f32.mrb[25].mxu1 }
 0x6cb   :  { %v5158_v2 = vadd.f32 %v5157_v1, %v5156_v63  ;;  %v5159_v3 = vpop.f32.mrb[26].mxu1 }
 0x6cc   :  { %v5160_v4 = vpop.f32.mrb[27].mxu1 }
 0x6cd   :  { %v4432_v7 = vadd.f32 %v5158_v2, %v2991_v6 }
 0x6e9   :  { %v5178_v41 = vpop.f32.mrb[28].mxu1 }
 0x6ea   :  { %v5179_v44 = vpop.f32.mrb[29].mxu1 }
 0x6eb   :  { %v5180_v8 = vadd.f32 %v5179_v44, %v5178_v41  ;;  %v5181_v47 = vpop.f32.mrb[30].mxu1 }
 0x6ec   :  { %v5182_v9 = vpop.f32.mrb[31].mxu1 }
 0x6ed   :  { %v4472_v10 = vadd.f32 %v5180_v8, %v4432_v7 }
 0x6ef   :  { %v5077_v11 = vmul.f32 -1.442695, %v4472_v10 }
 0x6f1   :  { %6056 = vpow2.f32 %v5077_v11 }
 0x6fb   :  { %v6057_v12 = vpop.eup %6056 }
 0x6fc   :  { %v4504_v13 = vadd.f32 1.0, %v6057_v12 }
 0x6fe   :  { %6058 = vrcp.f32 %v4504_v13 }
 0x708   :  { %v6059_v14 = vpop.eup %6058 }
 0x709   :  { %4525 = vst [vmem:[%s6539_s13 + $0x30] sm:$0xff] %v6059_v14 }
 0x728   :  { %v4390_v21 = vpop.f32.mrb[20].mxu0 }
 0x729   :  { %v5234_v24 = vadd.f32 %v4390_v21, %v2983_v18  ;;  %v4392_v26 = vpop.f32.mrb[21].mxu0 }
 0x72a   :  { %v5235_v28 = vadd.f32 %v4392_v26, %v2987_v20  ;;  %v4394_v16 = vpop.f32.mrb[22].mxu0 }
 0x72b   :  { %v5075_v29 = vmul.f32 -1.442695, %v5234_v24  ;;  %v4395_v30 = vpop.f32.mrb[23].mxu0 }
 0x72c   :  { %v5076_v31 = vmul.f32 -1.442695, %v5235_v28 }
 0x72d   :  { %6060 = vpow2.f32 %v5075_v29 }
 0x72e   :  { %6062 = vpow2.f32 %v5076_v31 }
 0x737   :  { %v6061_v33 = vpop.eup %6060 }
 0x738   :  { %v6063_v34 = vpop.eup %6062  ;;  %v4502_v35 = vadd.f32 1.0, %v6061_v33 }
 0x739   :  { %v4503_v36 = vadd.f32 1.0, %v6063_v34 }
 0x73a   :  { %6064 = vrcp.f32 %v4502_v35 }
 0x73b   :  { %6066 = vrcp.f32 %v4503_v36 }
 0x744   :  { %v6065_v22 = vpop.eup %6064 }
 0x745   :  { %v6067_v37 = vpop.eup %6066  ;;  %4523 = vst [vmem:[%s6539_s13 + $0x20] sm:$0xff] %v6065_v22 }
 0x746   :  { %4524 = vst [vmem:[%s6539_s13 + $0x28] sm:$0xff] %v6067_v37 }
 0x747   :  { %4530 = vsyncpa [#allocation3], 1 }
 0x748   :  { %4531 = vsyncpa [#allocation5], 1 }
 0x749   :  { %4532 = vsyncpa [#allocation8], 1 }

</bundles_post_ra>
